<compile_context>
chip_gen: v7x
topology: tpu7x:2x2x1
jax: 0.10.0
libtpu: 0.0.40
codegen_flags: <defaults>
</compile_context>

<pallas_src>
import functools

import jax
import jax.numpy as jnp
from jax import lax
from jax.experimental import pallas as pl
from jax.experimental.pallas import tpu as pltpu

TM_MAX = 256   # im2col rows per grid step (>=2 steps at M=512 -> megacore on v7x)
LANE = 128


def _round_up(x, m):
    return ((x + m - 1) // m) * m


# ----------------------------- Pallas kernel ------------------------------- #
def _conv_mm_kernel(a_ref, b_ref, bias_ref, o_ref):
    # a_ref: (tm, Kp) bf16 im2col tile; b_ref: (Kp, Cout) bf16; bias_ref: (1, Cout) f32
    acc = jnp.dot(a_ref[...], b_ref[...], preferred_element_type=jnp.float32)
    acc = acc + bias_ref[...]                       # bias add in f32
    # fused LeakyReLU(0.2): single VALU max instead of compare+select
    o_ref[...] = jnp.maximum(acc, 0.2 * acc).astype(o_ref.dtype)


def matmul_bias_lrelu(a, b, bias):
    """a: (M, Kp) bf16, b: (Kp, Cout) bf16, bias: (Cout,) f32 -> (M, Cout) f32."""
    M, K = a.shape
    _, Cout = b.shape
    tm = min(TM_MAX, _round_up(M, 8))
    grid_m = pl.cdiv(M, tm)          # ragged last block masked by Pallas; no HBM pad copy
    cost = pl.CostEstimate(
        flops=2 * M * K * Cout,
        transcendentals=0,
        bytes_accessed=M * K * 2 + K * Cout * 2 + Cout * 4 + M * Cout * 4,
    )
    # TODO(synk): lane-dense (Cout, TM) transposed output (dense vst, fewer MXU pushes at
    # Cout=4-12) needs a channel-major im2col / extra XLA transposes; at <=200 KiB output
    # per call the layout plumbing costs as much as it saves, so the natural layout is kept.
    return pl.pallas_call(
        _conv_mm_kernel,
        out_shape=jax.ShapeDtypeStruct((M, Cout), jnp.float32),
        grid=(grid_m,),
        in_specs=[
            pl.BlockSpec((tm, K), lambda i: (i, 0)),
            pl.BlockSpec((K, Cout), lambda i: (0, 0)),
            pl.BlockSpec((1, Cout), lambda i: (0, 0)),
        ],
        out_specs=pl.BlockSpec((tm, Cout), lambda i: (i, 0)),
        compiler_params=pltpu.CompilerParams(
            dimension_semantics=("parallel",),   # M-steps shard across v7x's 2 TensorCores
            # Explicit VMEM budget: double-buffered blocks here are < 1 MiB total, well
            # under the 32 MiB scoped default on every chip incl. v7x (64 MiB physical).
            vmem_limit_bytes=32 * 1024 * 1024,
        ),
        cost_estimate=cost,
    )(a, b, bias.reshape(1, Cout))


# ------------------------------ JAX glue ------------------------------------ #
def conv3d_lrelu(x, w, bias, stride):
    """Conv3d(ksize=w.shape[0], stride, padding=1) + LeakyReLU(0.2).
    x: (N, D, H, W, Cin) f32; w: (k, k, k, Cin, Cout) f32; bias: (Cout,) f32."""
    k = w.shape[0]
    cin, cout = w.shape[3], w.shape[4]
    xp = jnp.pad(x.astype(jnp.bfloat16), ((0, 0), (1, 1), (1, 1), (1, 1), (0, 0)))
    N, Dp, Hp, Wp, _ = xp.shape
    Do = (Dp - k) // stride + 1
    Ho = (Hp - k) // stride + 1
    Wo = (Wp - k) // stride + 1
    # im2col patch extraction in bf16, compiled/fused under the surrounding jit.
    # TODO(synk): move patch extraction into the kernel (per-tap grid axis + f32 VMEM
    # accumulator) to avoid the k^3 HBM blowup of the im2col matrix at realistic sizes.
    cols = []
    for dz in range(k):
        for dy in range(k):
            for dx in range(k):
                cols.append(
                    xp[:, dz:dz + (Do - 1) * stride + 1:stride,
                          dy:dy + (Ho - 1) * stride + 1:stride,
                          dx:dx + (Wo - 1) * stride + 1:stride, :]
                )
    K = k * k * k * cin
    Kp = _round_up(K, LANE)                    # lane-dense K for the (tm, K) load path
    if Kp > K:                                 # zero tap: padding at concat time, no extra pass
        cols.append(jnp.zeros((N, Do, Ho, Wo, Kp - K), jnp.bfloat16))
    A = jnp.concatenate(cols, axis=-1).reshape(N * Do * Ho * Wo, Kp)
    B = w.reshape(K, cout).astype(jnp.bfloat16)   # (dz,dy,dx,cin) ordering matches A columns
    if Kp > K:
        B = jnp.concatenate([B, jnp.zeros((Kp - K, cout), jnp.bfloat16)], axis=0)
    out = matmul_bias_lrelu(A, B, bias)
    return out.reshape(N, Do, Ho, Wo, cout)


def _upsample1d_2x(x, axis):
    """1D linear upsample x2 along `axis`, align_corners=False (PyTorch semantics).
    Gather-free: out[2j] = 0.75*x[j] + 0.25*x[j-1], out[2j+1] = 0.75*x[j] + 0.25*x[j+1],
    with edge replication at the borders, then even/odd interleave via stack+reshape."""
    size = x.shape[axis]
    x_prev = jnp.concatenate(
        [lax.slice_in_dim(x, 0, 1, axis=axis), lax.slice_in_dim(x, 0, size - 1, axis=axis)],
        axis=axis)
    x_next = jnp.concatenate(
        [lax.slice_in_dim(x, 1, size, axis=axis), lax.slice_in_dim(x, size - 1, size, axis=axis)],
        axis=axis)
    even = 0.75 * x + 0.25 * x_prev
    odd = 0.75 * x + 0.25 * x_next
    stacked = jnp.stack([even, odd], axis=axis + 1)
    new_shape = list(x.shape)
    new_shape[axis] = size * 2
    return stacked.reshape(new_shape)


def upsample_trilinear2x(x):
    """nn.Upsample(scale_factor=2, mode='trilinear', align_corners=False) on NDHWC."""
    x = _upsample1d_2x(x, 1)
    x = _upsample1d_2x(x, 2)
    x = _upsample1d_2x(x, 3)
    return x


# --------------------------- Stage / Backbone ------------------------------- #
def init_stage_params(key, cin, cout, stride):
    k1 = 4 if stride == 2 else 3
    ks = jax.random.split(key, 4)
    return dict(
        w1=jax.random.normal(ks[0], (k1, k1, k1, cin, cout), jnp.float32) * 0.1,
        b1=jax.random.normal(ks[1], (cout,), jnp.float32) * 0.01,
        w2=jax.random.normal(ks[2], (3, 3, 3, cout, cout), jnp.float32) * 0.1,
        b2=jax.random.normal(ks[3], (cout,), jnp.float32) * 0.01,
    )


def stage_forward(params, x, stride):
    # bnorm=False (Backbone default); Dropout3d is identity in eval mode.
    # TODO(synk): fuse both convs of a Stage into one pallas_call with the conv1 output
    # held in VMEM scratch (needs in-kernel halo/patch handling for the 3x3x3 conv2).
    x = conv3d_lrelu(x, params["w1"], params["b1"], stride)
    x = conv3d_lrelu(x, params["w2"], params["b2"], 1)
    return x


def init_backbone(key, enc_feat, dec_feat, in_channels=1, skip_connections=True):
    keys = jax.random.split(key, len(enc_feat) + len(dec_feat))
    encoder, prev_feat = [], in_channels
    for i, feat in enumerate(enc_feat):
        encoder.append(init_stage_params(keys[i], prev_feat, feat, stride=2))
        prev_feat = feat
    if skip_connections:
        enc_history = list(reversed([in_channels] + enc_feat))
        dec_out = [enc_history[i + 1] + dec_feat[i] for i in range(len(dec_feat))]
        dec_in = [enc_history[0]] + dec_out[:-1]
    else:
        dec_out = dec_feat
        dec_in = enc_feat[-1:] + dec_out[:-1]
    decoder = []
    for i, feat in enumerate(dec_feat):
        decoder.append(init_stage_params(keys[len(enc_feat) + i], dec_in[i], feat, stride=1))
    return dict(encoder=encoder, decoder=decoder)


@functools.partial(jax.jit, static_argnames=("skip_connections",))
def backbone_forward(params, x, skip_connections=True):
    """Returns list of decoder activations, coarse to fine (like the PyTorch module).
    The whole forward (im2col, pallas_calls, upsample, concat) compiles to one XLA program."""
    x_enc = [x]
    for p in params["encoder"]:
        x_enc.append(stage_forward(p, x_enc[-1], stride=2))
    x = x_enc.pop()
    x_dec = [x]
    for p in params["decoder"]:
        x = stage_forward(p, x, stride=1)
        x = upsample_trilinear2x(x)
        if skip_connections:
            x = jnp.concatenate([x, x_enc.pop()], axis=-1)  # channel concat (axis=-1 in NDHWC)
        x_dec.append(x)
    return x_dec


# --------------------------------- main ------------------------------------- #
if __name__ == "__main__":
    key = jax.random.PRNGKey(0)
    k_param, k_x = jax.random.split(key)

    enc_feat = [4, 8]
    dec_feat = [8, 4]
    in_channels = 1
    N, S = 1, 16  # batch, cubic spatial size

    params = init_backbone(k_param, enc_feat, dec_feat, in_channels=in_channels)
    x = jax.random.normal(k_x, (N, S, S, S, in_channels), jnp.float32)  # NDHWC

    outs = backbone_forward(params, x)
    outs = [jax.block_until_ready(o) for o in outs]

    # Expected (NDHWC): [(1,4,4,4,8), (1,8,8,8,12), (1,16,16,16,5)]
    expected = [(N, 4, 4, 4, 8), (N, 8, 8, 8, 12), (N, 16, 16, 16, 5)]
    assert [tuple(o.shape) for o in outs] == expected, [o.shape for o in outs]
    assert all(bool(jnp.all(jnp.isfinite(o))) for o in outs)

    print("KERNEL_OK")
</pallas_src>

<mosaic_0001>
module attributes {stable_mosaic.version = 11 : i64} {
  func.func @_conv_mm_kernel(%arg0: i32, %arg1: memref<256x128xbf16, #tpu.memory_space<vmem>>, %arg2: memref<128x4xbf16, #tpu.memory_space<vmem>>, %arg3: memref<1x4xf32, #tpu.memory_space<vmem>>, %arg4: memref<256x4xf32, #tpu.memory_space<vmem>>) attributes {dimension_semantics = [#tpu.dimension_semantics<parallel>], iteration_bounds = array<i64: 2>, scalar_prefetch = 0 : i64, scratch_operands = 0 : i64, tpu.core_type = #tpu.core_type<tc>, window_params = [{transform_indices = @transform_0, window_bounds = array<i64: 256, 128>}, {pipeline_mode = #tpu.pipeline_mode<synchronous>, transform_indices = @transform_1, window_bounds = array<i64: 128, 4>}, {pipeline_mode = #tpu.pipeline_mode<synchronous>, transform_indices = @transform_2, window_bounds = array<i64: 1, 4>}, {transform_indices = @transform_3, window_bounds = array<i64: 256, 4>}]} {
    %c0 = arith.constant 0 : index
    %c0_0 = arith.constant 0 : index
    %0 = vector.load %arg1[%c0, %c0_0] : memref<256x128xbf16, #tpu.memory_space<vmem>>, vector<256x128xbf16>
    %c0_1 = arith.constant 0 : index
    %c0_2 = arith.constant 0 : index
    %1 = vector.load %arg2[%c0_1, %c0_2] : memref<128x4xbf16, #tpu.memory_space<vmem>>, vector<128x4xbf16>
    %cst = arith.constant dense<0.000000e+00> : vector<256x4xf32>
    %2 = tpu.matmul %0, %1, %cst {dimension_numbers = #tpu.dot_dimension_numbers<[1], [0], [0], [1], [0, 0, 1, 1], [], []>} : vector<256x128xbf16>, vector<128x4xbf16>, vector<256x4xf32> -> vector<256x4xf32>
    %c0_3 = arith.constant 0 : index
    %c0_4 = arith.constant 0 : index
    %3 = vector.load %arg3[%c0_3, %c0_4] : memref<1x4xf32, #tpu.memory_space<vmem>>, vector<1x4xf32>
    %4 = vector.broadcast %3 : vector<1x4xf32> to vector<256x4xf32>
    %5 = arith.addf %2, %4 : vector<256x4xf32>
    %cst_5 = arith.constant 2.000000e-01 : f32
    %6 = vector.broadcast %cst_5 : f32 to vector<256x4xf32>
    %7 = arith.mulf %6, %5 : vector<256x4xf32>
    %8 = arith.maximumf %5, %7 : vector<256x4xf32>
    %c0_6 = arith.constant 0 : index
    %c0_7 = arith.constant 0 : index
    %9 = vector.load %arg4[%c0_6, %c0_7] : memref<256x4xf32, #tpu.memory_space<vmem>>, vector<256x4xf32>
    tpu.vector_store %arg4[%c0_6, %c0_7], %8 {strides = array<i32>} : memref<256x4xf32, #tpu.memory_space<vmem>>, vector<256x4xf32>,
    return
  }
  func.func @transform_0(%arg0: i32) -> (i32, i32) {
    %c0_i32 = arith.constant 0 : i32
    %c0_i32_0 = arith.constant 0 : i32
    return %arg0, %c0_i32 : i32, i32
  }
  func.func @transform_1(%arg0: i32) -> (i32, i32) {
    %c0_i32 = arith.constant 0 : i32
    %c0_i32_0 = arith.constant 0 : i32
    %c0_i32_1 = arith.constant 0 : i32
    return %c0_i32, %c0_i32_0 : i32, i32
  }
  func.func @transform_2(%arg0: i32) -> (i32, i32) {
    %c0_i32 = arith.constant 0 : i32
    %c0_i32_0 = arith.constant 0 : i32
    %c0_i32_1 = arith.constant 0 : i32
    return %c0_i32, %c0_i32_0 : i32, i32
  }
  func.func @transform_3(%arg0: i32) -> (i32, i32) {
    %c0_i32 = arith.constant 0 : i32
    %c0_i32_0 = arith.constant 0 : i32
    return %arg0, %c0_i32 : i32, i32
  }
}

module attributes {stable_mosaic.version = 11 : i64} {
  func.func @_conv_mm_kernel(%arg0: i32, %arg1: memref<64x256xbf16, #tpu.memory_space<vmem>>, %arg2: memref<256x8xbf16, #tpu.memory_space<vmem>>, %arg3: memref<1x8xf32, #tpu.memory_space<vmem>>, %arg4: memref<64x8xf32, #tpu.memory_space<vmem>>) attributes {dimension_semantics = [#tpu.dimension_semantics<parallel>], iteration_bounds = array<i64: 1>, scalar_prefetch = 0 : i64, scratch_operands = 0 : i64, tpu.core_type = #tpu.core_type<tc>, window_params = [{transform_indices = @transform_0, window_bounds = array<i64: 64, 256>}, {pipeline_mode = #tpu.pipeline_mode<synchronous>, transform_indices = @transform_1, window_bounds = array<i64: 256, 8>}, {pipeline_mode = #tpu.pipeline_mode<synchronous>, transform_indices = @transform_2, window_bounds = array<i64: 1, 8>}, {transform_indices = @transform_3, window_bounds = array<i64: 64, 8>}]} {
    %c0 = arith.constant 0 : index
    %c0_0 = arith.constant 0 : index
    %0 = vector.load %arg1[%c0, %c0_0] : memref<64x256xbf16, #tpu.memory_space<vmem>>, vector<64x256xbf16>
    %c0_1 = arith.constant 0 : index
    %c0_2 = arith.constant 0 : index
    %1 = vector.load %arg2[%c0_1, %c0_2] : memref<256x8xbf16, #tpu.memory_space<vmem>>, vector<256x8xbf16>
    %cst = arith.constant dense<0.000000e+00> : vector<64x8xf32>
    %2 = tpu.matmul %0, %1, %cst {dimension_numbers = #tpu.dot_dimension_numbers<[1], [0], [0], [1], [0, 0, 1, 1], [], []>} : vector<64x256xbf16>, vector<256x8xbf16>, vector<64x8xf32> -> vector<64x8xf32>
    %c0_3 = arith.constant 0 : index
    %c0_4 = arith.constant 0 : index
    %3 = vector.load %arg3[%c0_3, %c0_4] : memref<1x8xf32, #tpu.memory_space<vmem>>, vector<1x8xf32>
    %4 = vector.broadcast %3 : vector<1x8xf32> to vector<64x8xf32>
    %5 = arith.addf %2, %4 : vector<64x8xf32>
    %cst_5 = arith.constant 2.000000e-01 : f32
    %6 = vector.broadcast %cst_5 : f32 to vector<64x8xf32>
    %7 = arith.mulf %6, %5 : vector<64x8xf32>
    %8 = arith.maximumf %5, %7 : vector<64x8xf32>
    %c0_6 = arith.constant 0 : index
    %c0_7 = arith.constant 0 : index
    %9 = vector.load %arg4[%c0_6, %c0_7] : memref<64x8xf32, #tpu.memory_space<vmem>>, vector<64x8xf32>
    tpu.vector_store %arg4[%c0_6, %c0_7], %8 {strides = array<i32>} : memref<64x8xf32, #tpu.memory_space<vmem>>, vector<64x8xf32>,
    return
  }
  func.func @transform_0(%arg0: i32) -> (i32, i32) {
    %c0_i32 = arith.constant 0 : i32
    %c0_i32_0 = arith.constant 0 : i32
    return %arg0, %c0_i32 : i32, i32
  }
  func.func @transform_1(%arg0: i32) -> (i32, i32) {
    %c0_i32 = arith.constant 0 : i32
    %c0_i32_0 = arith.constant 0 : i32
    %c0_i32_1 = arith.constant 0 : i32
    return %c0_i32, %c0_i32_0 : i32, i32
  }
  func.func @transform_2(%arg0: i32) -> (i32, i32) {
    %c0_i32 = arith.constant 0 : i32
    %c0_i32_0 = arith.constant 0 : i32
    %c0_i32_1 = arith.constant 0 : i32
    return %c0_i32, %c0_i32_0 : i32, i32
  }
  func.func @transform_3(%arg0: i32) -> (i32, i32) {
    %c0_i32 = arith.constant 0 : i32
    %c0_i32_0 = arith.constant 0 : i32
    return %arg0, %c0_i32 : i32, i32
  }
}

module attributes {stable_mosaic.version = 11 : i64} {
  func.func @_conv_mm_kernel(%arg0: i32, %arg1: memref<256x384xbf16, #tpu.memory_space<vmem>>, %arg2: memref<384x4xbf16, #tpu.memory_space<vmem>>, %arg3: memref<1x4xf32, #tpu.memory_space<vmem>>, %arg4: memref<256x4xf32, #tpu.memory_space<vmem>>) attributes {dimension_semantics = [#tpu.dimension_semantics<parallel>], iteration_bounds = array<i64: 2>, scalar_prefetch = 0 : i64, scratch_operands = 0 : i64, tpu.core_type = #tpu.core_type<tc>, window_params = [{transform_indices = @transform_0, window_bounds = array<i64: 256, 384>}, {pipeline_mode = #tpu.pipeline_mode<synchronous>, transform_indices = @transform_1, window_bounds = array<i64: 384, 4>}, {pipeline_mode = #tpu.pipeline_mode<synchronous>, transform_indices = @transform_2, window_bounds = array<i64: 1, 4>}, {transform_indices = @transform_3, window_bounds = array<i64: 256, 4>}]} {
    %c0 = arith.constant 0 : index
    %c0_0 = arith.constant 0 : index
    %0 = vector.load %arg1[%c0, %c0_0] : memref<256x384xbf16, #tpu.memory_space<vmem>>, vector<256x384xbf16>
    %c0_1 = arith.constant 0 : index
    %c0_2 = arith.constant 0 : index
    %1 = vector.load %arg2[%c0_1, %c0_2] : memref<384x4xbf16, #tpu.memory_space<vmem>>, vector<384x4xbf16>
    %cst = arith.constant dense<0.000000e+00> : vector<256x4xf32>
    %2 = tpu.matmul %0, %1, %cst {dimension_numbers = #tpu.dot_dimension_numbers<[1], [0], [0], [1], [0, 0, 1, 1], [], []>} : vector<256x384xbf16>, vector<384x4xbf16>, vector<256x4xf32> -> vector<256x4xf32>
    %c0_3 = arith.constant 0 : index
    %c0_4 = arith.constant 0 : index
    %3 = vector.load %arg3[%c0_3, %c0_4] : memref<1x4xf32, #tpu.memory_space<vmem>>, vector<1x4xf32>
    %4 = vector.broadcast %3 : vector<1x4xf32> to vector<256x4xf32>
    %5 = arith.addf %2, %4 : vector<256x4xf32>
    %cst_5 = arith.constant 2.000000e-01 : f32
    %6 = vector.broadcast %cst_5 : f32 to vector<256x4xf32>
    %7 = arith.mulf %6, %5 : vector<256x4xf32>
    %8 = arith.maximumf %5, %7 : vector<256x4xf32>
    %c0_6 = arith.constant 0 : index
    %c0_7 = arith.constant 0 : index
    %9 = vector.load %arg4[%c0_6, %c0_7] : memref<256x4xf32, #tpu.memory_space<vmem>>, vector<256x4xf32>
    tpu.vector_store %arg4[%c0_6, %c0_7], %8 {strides = array<i32>} : memref<256x4xf32, #tpu.memory_space<vmem>>, vector<256x4xf32>,
    return
  }
  func.func @transform_0(%arg0: i32) -> (i32, i32) {
    %c0_i32 = arith.constant 0 : i32
    %c0_i32_0 = arith.constant 0 : i32
    return %arg0, %c0_i32 : i32, i32
  }
  func.func @transform_1(%arg0: i32) -> (i32, i32) {
    %c0_i32 = arith.constant 0 : i32
    %c0_i32_0 = arith.constant 0 : i32
    %c0_i32_1 = arith.constant 0 : i32
    return %c0_i32, %c0_i32_0 : i32, i32
  }
  func.func @transform_2(%arg0: i32) -> (i32, i32) {
    %c0_i32 = arith.constant 0 : i32
    %c0_i32_0 = arith.constant 0 : i32
    %c0_i32_1 = arith.constant 0 : i32
    return %c0_i32, %c0_i32_0 : i32, i32
  }
  func.func @transform_3(%arg0: i32) -> (i32, i32) {
    %c0_i32 = arith.constant 0 : i32
    %c0_i32_0 = arith.constant 0 : i32
    return %arg0, %c0_i32 : i32, i32
  }
}

</mosaic_0001>

<bundles_post_ra>
// kernel: backbone_forward.8
= control target key start
LH: loop header
LB: loop body
LE: loop exit
PB: predicated region body
PF: predicated region fallthrough
CT: control target
= control target key end

     0   :  { %s872_s12 = smov 0   ;;  %s1038_s0 = inlined_call_operand.vmem [shape: bf16[512,128], index: 0, kind: input, shape index: {}]   ;;  %s1039_s1 = inlined_call_operand.vmem [shape: bf16[128,4], index: 1, kind: input, shape index: {}]   ;;  %s1040_s2 = inlined_call_operand.vmem [shape: f32[1,4], index: 2, kind: input, shape index: {}]   ;;  %s1041_s3 = inlined_call_operand.vmem [shape: f32[512,4], index: 3, kind: output, shape index: {}]  }
   0x1 LB: > { %s688_s13 = sadd.s32 4294967295, %s850_s12   ;;  %p692_p0 = scmp.ge.s32.totalorder %s850_s12, 1  ;;  %s850_s12 = sphi %s872_s12, %s13_s12  }
   0x2   : > { %p138_p1 = scmp.lt.s32.totalorder %s850_s12, 3 }
   0x4   : > { %p139_p2 = pnand %p692_p0, %p138_p1 }
   0x5   : > { %v820_v0 = vld [vmem:[%s1039_s1] sm:$0xff] (!%p139_p2)   ;;  %s693_s16 = sshll.u32 (!%p139_p2), %s688_s13, 5  ;;  %v821_v1 = vld [vmem:[%s1039_s1 + $0x8] sm:$0xff] (!%p139_p2)   ;;  %v822_v2 = vld [vmem:[%s1039_s1 + $0x10] sm:$0xff] (!%p139_p2)   ;;  %vm599_vm0 = vcmask (!%p139_p2), 31744  }
   0x6   : > { %142 = sbr.rel (%p139_p2) target bundleno = 284 (0x11c), region = 32  ;;  %p163_p3 = scmp.lt.s32.totalorder (!%p139_p2), %s693_s16, 63  ;;  %748 = vmatprep.subr.bf16.mxu0 (!%p139_p2), %v820_v0  ;;  %796 = vmatprep.subr.bf16.mxu1 (!%p139_p2), %v820_v0  ;;  %v823_v3 = vld [vmem:[%s1039_s1 + $0x18] sm:$0xff] (!%p139_p2)   ;;  %v824_v6 = vld [vmem:[%s1039_s1 + $0x20] sm:$0xff] (!%p139_p2)   ;;  %v825_v7 = vld [vmem:[%s1039_s1 + $0x28] sm:$0xff] (!%p139_p2)  }
   0x7   : > { %749 = vmatpush3.bf16.msra.mxu0 (!%p139_p2), %v820_v0  ;;  %804 = vmatpush3.bf16.msra.mxu1 (!%p139_p2), %v820_v0  ;;  %v826_v8 = vld [vmem:[%s1039_s1 + $0x30] sm:$0xff] (!%p139_p2)   ;;  %v827_v9 = vld [vmem:[%s1039_s1 + $0x38] sm:$0xff] (!%p139_p2)   ;;  %v931_v24 = vld [vmem:[%s1040_s2] ss:$0 sm:$0xff] (!%p139_p2) }
   0x8   : > { %750 = vmatprep.subr.bf16.mxu0 (!%p139_p2), %v821_v1  ;;  %797 = vmatprep.subr.bf16.mxu1 (!%p139_p2), %v821_v1 }
   0xb   : > { %751 = vmatpush3.bf16.msra.mxu0 (!%p139_p2), %v821_v1  ;;  %805 = vmatpush3.bf16.msra.mxu1 (!%p139_p2), %v821_v1 }
   0xc   : > { %752 = vmatprep.subr.bf16.mxu0 (!%p139_p2), %v822_v2  ;;  %798 = vmatprep.subr.bf16.mxu1 (!%p139_p2), %v822_v2 }
   0xd   : > { %s1043_s16 = smov (!%p163_p3, %s693_s16), 63 }
   0xe   : > { %s694_s21 = sshll.u32 %s1043_s16, 2  ;;  %s696_s10 = sshll.u32 %s1043_s16, 3 }
   0xf   : > { %s895_s24 = scalar_lea.vmem %s1038_s0, %s694_s21  ;;  %753 = vmatpush3.bf16.msra.mxu0 %v822_v2  ;;  %806 = vmatpush3.bf16.msra.mxu1 %v822_v2  ;;  %s943_s14 = scalar_lea.vmem %s1041_s3, %s696_s10 }
  0x10   : > { %v828_v4 = vld [vmem:[%s895_s24] sm:$0xff]   ;;  %754 = vmatprep.subr.bf16.mxu0 %v823_v3  ;;  %799 = vmatprep.subr.bf16.mxu1 %v823_v3  ;;  %v830_v10 = vld [vmem:[%s895_s24 + $0x8] sm:$0xff]   ;;  %v832_v12 = vld [vmem:[%s895_s24 + $0x10] sm:$0xff]  }
  0x11   : > { %v829_v5 = vld [vmem:[%s895_s24 + $0x40] sm:$0xff]   ;;  %764 = vmatprep.mubr.bf16.mxu0 %v828_v4  ;;  %v831_v11 = vld [vmem:[%s895_s24 + $0x48] sm:$0xff]   ;;  %v833_v13 = vld [vmem:[%s895_s24 + $0x50] sm:$0xff]  }
  0x12   : > { %780 = vmatprep.mubr.bf16.mxu1 %v829_v5  ;;  %v834_v14 = vld [vmem:[%s895_s24 + $0x18] sm:$0xff]   ;;  %v836_v16 = vld [vmem:[%s895_s24 + $0x20] sm:$0xff]   ;;  %v838_v18 = vld [vmem:[%s895_s24 + $0x28] sm:$0xff]  }
  0x13   : > { %755 = vmatpush3.bf16.msra.mxu0 %v823_v3  ;;  %807 = vmatpush3.bf16.msra.mxu1 %v823_v3  ;;  %v835_v15 = vld [vmem:[%s895_s24 + $0x58] sm:$0xff]   ;;  %v837_v17 = vld [vmem:[%s895_s24 + $0x60] sm:$0xff]   ;;  %v839_v19 = vld [vmem:[%s895_s24 + $0x68] sm:$0xff]  }
  0x14   : > { %756 = vmatprep.subr.bf16.mxu0 %v824_v6  ;;  %800 = vmatprep.subr.bf16.mxu1 %v824_v6  ;;  %v840_v20 = vld [vmem:[%s895_s24 + $0x30] sm:$0xff]   ;;  %v842_v22 = vld [vmem:[%s895_s24 + $0x38] sm:$0xff]  }
  0x15   : > { %v841_v21 = vld [vmem:[%s895_s24 + $0x70] sm:$0xff]   ;;  %v843_v23 = vld [vmem:[%s895_s24 + $0x78] sm:$0xff]  }
  0x17   : > { %757 = vmatpush3.bf16.msra.mxu0 %v824_v6  ;;  %808 = vmatpush3.bf16.msra.mxu1 %v824_v6 }
  0x18   : > { %758 = vmatprep.subr.bf16.mxu0 %v825_v7  ;;  %801 = vmatprep.subr.bf16.mxu1 %v825_v7 }
  0x1b   : > { %759 = vmatpush3.bf16.msra.mxu0 %v825_v7  ;;  %809 = vmatpush3.bf16.msra.mxu1 %v825_v7 }
  0x1c   : > { %760 = vmatprep.subr.bf16.mxu0 %v826_v8  ;;  %802 = vmatprep.subr.bf16.mxu1 %v826_v8 }
  0x1f   : > { %761 = vmatpush3.bf16.msra.mxu0 %v826_v8  ;;  %810 = vmatpush3.bf16.msra.mxu1 %v826_v8 }
  0x20   : > { %762 = vmatprep.subr.bf16.mxu0 %v827_v9  ;;  %803 = vmatprep.subr.bf16.mxu1 %v827_v9 }
  0x23   : > { %763 = vmatpush3.bf16.msra.mxu0 %v827_v9  ;;  %811 = vmatpush3.bf16.msra.mxu1 %v827_v9 }
  0x26   : > { %765 = vmatmul.mubr.bf16.vlgmr.msra.gmra.mrb[0].mxu0 %v830_v10  ;;  %781 = vmatmul.mubr.bf16.vlgmr.msra.gmra.mrb[0].mxu1 %v831_v11 }
  0x27   : > { %768 = vmatprep.mubr.bf16.mxu0 %v832_v12  ;;  %784 = vmatprep.mubr.bf16.mxu1 %v833_v13 }
  0x2e   : > { %769 = vmatmul.mubr.bf16.gmra.mrb[4].mxu0 %v834_v14  ;;  %785 = vmatmul.mubr.bf16.gmra.mrb[4].mxu1 %v835_v15 }
  0x2f   : > { %772 = vmatprep.mubr.bf16.mxu0 %v836_v16  ;;  %788 = vmatprep.mubr.bf16.mxu1 %v837_v17 }
  0x36   : > { %773 = vmatmul.mubr.bf16.gmra.mrb[8].mxu0 %v838_v18  ;;  %789 = vmatmul.mubr.bf16.gmra.mrb[8].mxu1 %v839_v19 }
  0x37   : > { %776 = vmatprep.mubr.bf16.mxu0 %v840_v20  ;;  %792 = vmatprep.mubr.bf16.mxu1 %v841_v21 }
  0x3e   : > { %777 = vmatmul.mubr.bf16.gmra.mrb[12].mxu0 %v842_v22  ;;  %793 = vmatmul.mubr.bf16.gmra.mrb[12].mxu1 %v843_v23 }
  0xf9   : > { %v766_v25 = vpop.f32.mrb[0].mxu0  ;;  %v782_v26 = vpop.f32.mrb[0].mxu1 }
  0xfa   : > { %v417_v27 = vadd.f32 %v766_v25, %v931_v24  ;;  %v481_v28 = vadd.f32 %v782_v26, %v931_v24  ;;  %v408_v29 = vpop.f32.mrb[1].mxu0  ;;  %v472_v30 = vpop.f32.mrb[1].mxu1 }
  0xfb   : > { %v409_v31 = vadd.f32 %v931_v24, %v408_v29  ;;  %v473_v32 = vadd.f32 %v931_v24, %v472_v30  ;;  %v767_v33 = vpop.f32.mrb[2].mxu0  ;;  %v783_v34 = vpop.f32.mrb[2].mxu1 }
  0xfc   : > { %v537_v35 = vmul.f32 0.2, %v417_v27  ;;  %v553_v36 = vmul.f32 0.2, %v481_v28  ;;  %v420_v37 = vadd.f32 %v767_v33, %v931_v24  ;;  %v484_v38 = vadd.f32 %v783_v34, %v931_v24  ;;  %v411_v39 = vpop.f32.mrb[3].mxu0  ;;  %v475_v40 = vpop.f32.mrb[3].mxu1 }
  0xfd   : > { %v535_v41 = vmul.f32 0.2, %v409_v31  ;;  %v551_v42 = vmul.f32 0.2, %v473_v32  ;;  %v412_v43 = vadd.f32 %v931_v24, %v411_v39  ;;  %v476_v44 = vadd.f32 %v931_v24, %v475_v40 }
  0xfe   : > { %v569_v45 = vmax.f32 %v417_v27, %v537_v35  ;;  %v585_v46 = vmax.f32 %v481_v28, %v553_v36  ;;  %v538_v47 = vmul.f32 0.2, %v420_v37  ;;  %v554_v48 = vmul.f32 0.2, %v484_v38 }
  0xff   : > { %v567_v49 = vmax.f32 %v409_v31, %v535_v41  ;;  %v583_v50 = vmax.f32 %v473_v32, %v551_v42  ;;  %v536_v51 = vmul.f32 0.2, %v412_v43  ;;  %v552_v52 = vmul.f32 0.2, %v476_v44 }
 0x100   : > { %602 = vst.msk [vmem:[%s943_s14 + $0x10] sm:$0xff] %vm599_vm0, %v569_v45  ;;  %618 = vst.msk [vmem:[%s943_s14 + $0x90] sm:$0xff] %vm599_vm0, %v585_v46  ;;  %v570_v53 = vmax.f32 %v420_v37, %v538_v47  ;;  %v586_v54 = vmax.f32 %v484_v38, %v554_v48 }
 0x101   : > { %600 = vst.msk [vmem:[%s943_s14] sm:$0xff] %vm599_vm0, %v567_v49  ;;  %616 = vst.msk [vmem:[%s943_s14 + $0x80] sm:$0xff] %vm599_vm0, %v583_v50  ;;  %v568_v55 = vmax.f32 %v412_v43, %v536_v51  ;;  %v584_v56 = vmax.f32 %v476_v44, %v552_v52  ;;  %v770_v57 = vpop.f32.mrb[4].mxu0  ;;  %v786_v58 = vpop.f32.mrb[4].mxu1 }
 0x102   : > { %603 = vst.msk [vmem:[%s943_s14 + $0x18] sm:$0xff] %vm599_vm0, %v570_v53  ;;  %619 = vst.msk [vmem:[%s943_s14 + $0x98] sm:$0xff] %vm599_vm0, %v586_v54  ;;  %v433_v59 = vadd.f32 %v770_v57, %v931_v24  ;;  %v497_v60 = vadd.f32 %v786_v58, %v931_v24  ;;  %v424_v61 = vpop.f32.mrb[5].mxu0  ;;  %v488_v62 = vpop.f32.mrb[5].mxu1 }
 0x103   : > { %601 = vst.msk [vmem:[%s943_s14 + $0x8] sm:$0xff] %vm599_vm0, %v568_v55  ;;  %617 = vst.msk [vmem:[%s943_s14 + $0x88] sm:$0xff] %vm599_vm0, %v584_v56  ;;  %v425_v63 = vadd.f32 %v931_v24, %v424_v61  ;;  %v489_v0 = vadd.f32 %v931_v24, %v488_v62  ;;  %v771_v1 = vpop.f32.mrb[6].mxu0  ;;  %v787_v2 = vpop.f32.mrb[6].mxu1 }
 0x104   : > { %v541_v3 = vmul.f32 0.2, %v433_v59  ;;  %v557_v4 = vmul.f32 0.2, %v497_v60  ;;  %v436_v5 = vadd.f32 %v771_v1, %v931_v24  ;;  %v500_v6 = vadd.f32 %v787_v2, %v931_v24  ;;  %v427_v7 = vpop.f32.mrb[7].mxu0  ;;  %v491_v8 = vpop.f32.mrb[7].mxu1 }
 0x105   : > { %v539_v9 = vmul.f32 0.2, %v425_v63  ;;  %v555_v10 = vmul.f32 0.2, %v489_v0  ;;  %v428_v11 = vadd.f32 %v931_v24, %v427_v7  ;;  %v492_v12 = vadd.f32 %v931_v24, %v491_v8 }
 0x106   : > { %v573_v13 = vmax.f32 %v433_v59, %v541_v3  ;;  %v589_v14 = vmax.f32 %v497_v60, %v557_v4  ;;  %v542_v15 = vmul.f32 0.2, %v436_v5  ;;  %v558_v16 = vmul.f32 0.2, %v500_v6 }
 0x107   : > { %v571_v17 = vmax.f32 %v425_v63, %v539_v9  ;;  %v587_v18 = vmax.f32 %v489_v0, %v555_v10  ;;  %v540_v19 = vmul.f32 0.2, %v428_v11  ;;  %v556_v20 = vmul.f32 0.2, %v492_v12 }
 0x108   : > { %606 = vst.msk [vmem:[%s943_s14 + $0x30] sm:$0xff] %vm599_vm0, %v573_v13  ;;  %622 = vst.msk [vmem:[%s943_s14 + $0xb0] sm:$0xff] %vm599_vm0, %v589_v14  ;;  %v574_v21 = vmax.f32 %v436_v5, %v542_v15  ;;  %v590_v22 = vmax.f32 %v500_v6, %v558_v16 }
 0x109   : > { %604 = vst.msk [vmem:[%s943_s14 + $0x20] sm:$0xff] %vm599_vm0, %v571_v17  ;;  %620 = vst.msk [vmem:[%s943_s14 + $0xa0] sm:$0xff] %vm599_vm0, %v587_v18  ;;  %v572_v23 = vmax.f32 %v428_v11, %v540_v19  ;;  %v588_v25 = vmax.f32 %v492_v12, %v556_v20  ;;  %v774_v26 = vpop.f32.mrb[8].mxu0  ;;  %v790_v27 = vpop.f32.mrb[8].mxu1 }
 0x10a   : > { %607 = vst.msk [vmem:[%s943_s14 + $0x38] sm:$0xff] %vm599_vm0, %v574_v21  ;;  %623 = vst.msk [vmem:[%s943_s14 + $0xb8] sm:$0xff] %vm599_vm0, %v590_v22  ;;  %v449_v28 = vadd.f32 %v774_v26, %v931_v24  ;;  %v513_v29 = vadd.f32 %v790_v27, %v931_v24  ;;  %v440_v30 = vpop.f32.mrb[9].mxu0  ;;  %v504_v31 = vpop.f32.mrb[9].mxu1 }
 0x10b   : > { %605 = vst.msk [vmem:[%s943_s14 + $0x28] sm:$0xff] %vm599_vm0, %v572_v23  ;;  %621 = vst.msk [vmem:[%s943_s14 + $0xa8] sm:$0xff] %vm599_vm0, %v588_v25  ;;  %v441_v32 = vadd.f32 %v931_v24, %v440_v30  ;;  %v505_v33 = vadd.f32 %v931_v24, %v504_v31  ;;  %v775_v34 = vpop.f32.mrb[10].mxu0  ;;  %v791_v35 = vpop.f32.mrb[10].mxu1 }
 0x10c   : > { %v545_v36 = vmul.f32 0.2, %v449_v28  ;;  %v561_v37 = vmul.f32 0.2, %v513_v29  ;;  %v452_v38 = vadd.f32 %v775_v34, %v931_v24  ;;  %v516_v39 = vadd.f32 %v791_v35, %v931_v24  ;;  %v443_v40 = vpop.f32.mrb[11].mxu0  ;;  %v507_v41 = vpop.f32.mrb[11].mxu1 }
 0x10d   : > { %v543_v42 = vmul.f32 0.2, %v441_v32  ;;  %v559_v43 = vmul.f32 0.2, %v505_v33  ;;  %v444_v44 = vadd.f32 %v931_v24, %v443_v40  ;;  %v508_v45 = vadd.f32 %v931_v24, %v507_v41 }
 0x10e   : > { %v577_v46 = vmax.f32 %v449_v28, %v545_v36  ;;  %v593_v47 = vmax.f32 %v513_v29, %v561_v37  ;;  %v546_v48 = vmul.f32 0.2, %v452_v38  ;;  %v562_v49 = vmul.f32 0.2, %v516_v39 }
 0x10f   : > { %v575_v50 = vmax.f32 %v441_v32, %v543_v42  ;;  %v591_v51 = vmax.f32 %v505_v33, %v559_v43  ;;  %v544_v52 = vmul.f32 0.2, %v444_v44  ;;  %v560_v53 = vmul.f32 0.2, %v508_v45 }
 0x110   : > { %610 = vst.msk [vmem:[%s943_s14 + $0x50] sm:$0xff] %vm599_vm0, %v577_v46  ;;  %626 = vst.msk [vmem:[%s943_s14 + $0xd0] sm:$0xff] %vm599_vm0, %v593_v47  ;;  %v578_v54 = vmax.f32 %v452_v38, %v546_v48  ;;  %v594_v55 = vmax.f32 %v516_v39, %v562_v49 }
 0x111   : > { %608 = vst.msk [vmem:[%s943_s14 + $0x40] sm:$0xff] %vm599_vm0, %v575_v50  ;;  %624 = vst.msk [vmem:[%s943_s14 + $0xc0] sm:$0xff] %vm599_vm0, %v591_v51  ;;  %v576_v56 = vmax.f32 %v444_v44, %v544_v52  ;;  %v592_v57 = vmax.f32 %v508_v45, %v560_v53  ;;  %v778_v58 = vpop.f32.mrb[12].mxu0  ;;  %v794_v59 = vpop.f32.mrb[12].mxu1 }
 0x112   : > { %611 = vst.msk [vmem:[%s943_s14 + $0x58] sm:$0xff] %vm599_vm0, %v578_v54  ;;  %627 = vst.msk [vmem:[%s943_s14 + $0xd8] sm:$0xff] %vm599_vm0, %v594_v55  ;;  %v465_v60 = vadd.f32 %v778_v58, %v931_v24  ;;  %v529_v61 = vadd.f32 %v794_v59, %v931_v24  ;;  %v456_v62 = vpop.f32.mrb[13].mxu0  ;;  %v520_v63 = vpop.f32.mrb[13].mxu1 }
 0x113   : > { %609 = vst.msk [vmem:[%s943_s14 + $0x48] sm:$0xff] %vm599_vm0, %v576_v56  ;;  %625 = vst.msk [vmem:[%s943_s14 + $0xc8] sm:$0xff] %vm599_vm0, %v592_v57  ;;  %v457_v0 = vadd.f32 %v931_v24, %v456_v62  ;;  %v521_v1 = vadd.f32 %v931_v24, %v520_v63  ;;  %v779_v2 = vpop.f32.mrb[14].mxu0  ;;  %v795_v3 = vpop.f32.mrb[14].mxu1 }
 0x114   : > { %v549_v4 = vmul.f32 0.2, %v465_v60  ;;  %v565_v5 = vmul.f32 0.2, %v529_v61  ;;  %v468_v6 = vadd.f32 %v779_v2, %v931_v24  ;;  %v532_v7 = vadd.f32 %v795_v3, %v931_v24  ;;  %v459_v8 = vpop.f32.mrb[15].mxu0  ;;  %v523_v9 = vpop.f32.mrb[15].mxu1 }
 0x115   : > { %v547_v10 = vmul.f32 0.2, %v457_v0  ;;  %v563_v11 = vmul.f32 0.2, %v521_v1  ;;  %v460_v12 = vadd.f32 %v931_v24, %v459_v8  ;;  %v524_v13 = vadd.f32 %v931_v24, %v523_v9 }
 0x116   : > { %v581_v14 = vmax.f32 %v465_v60, %v549_v4  ;;  %v597_v15 = vmax.f32 %v529_v61, %v565_v5  ;;  %v550_v16 = vmul.f32 0.2, %v468_v6  ;;  %v566_v17 = vmul.f32 0.2, %v532_v7 }
 0x117   : > { %v579_v18 = vmax.f32 %v457_v0, %v547_v10  ;;  %v595_v19 = vmax.f32 %v521_v1, %v563_v11  ;;  %v548_v20 = vmul.f32 0.2, %v460_v12  ;;  %v564_v21 = vmul.f32 0.2, %v524_v13 }
 0x118   : > { %614 = vst.msk [vmem:[%s943_s14 + $0x70] sm:$0xff] %vm599_vm0, %v581_v14  ;;  %630 = vst.msk [vmem:[%s943_s14 + $0xf0] sm:$0xff] %vm599_vm0, %v597_v15  ;;  %v582_v22 = vmax.f32 %v468_v6, %v550_v16  ;;  %v598_v23 = vmax.f32 %v532_v7, %v566_v17 }
 0x119   : > { %612 = vst.msk [vmem:[%s943_s14 + $0x60] sm:$0xff] %vm599_vm0, %v579_v18  ;;  %628 = vst.msk [vmem:[%s943_s14 + $0xe0] sm:$0xff] %vm599_vm0, %v595_v19  ;;  %v580_v24 = vmax.f32 %v460_v12, %v548_v20  ;;  %v596_v25 = vmax.f32 %v524_v13, %v564_v21 }
 0x11a   : > { %615 = vst.msk [vmem:[%s943_s14 + $0x78] sm:$0xff] %vm599_vm0, %v582_v22  ;;  %631 = vst.msk [vmem:[%s943_s14 + $0xf8] sm:$0xff] %vm599_vm0, %v598_v23 }
 0x11b   : > { %613 = vst.msk [vmem:[%s943_s14 + $0x68] sm:$0xff] %vm599_vm0, %v580_v24  ;;  %629 = vst.msk [vmem:[%s943_s14 + $0xe8] sm:$0xff] %vm599_vm0, %v596_v25 }
 0x11c PF: > { %s13_s12 = sadd.s32 1, %s850_s12  }
 0x11d   : > { %p10_p4 = scmp.ge.s32.totalorder %s13_s12, 4  }
 0x11f   :  { %12 = sbr.rel (!%p10_p4) target bundleno = 1 (0x1), region = 62 }

// kernel: backbone_forward.10
= control target key start
LH: loop header
LB: loop body
LE: loop exit
PB: predicated region body
PF: predicated region fallthrough
CT: control target
= control target key end

     0   :  { %vm279_vm0 = vcmask 64512   ;;  %s528_s1 = inlined_call_operand.vmem [shape: bf16[256,8], index: 1, kind: input, shape index: {}]   ;;  %s529_s0 = inlined_call_operand.vmem [shape: bf16[64,256], index: 0, kind: input, shape index: {}]   ;;  %s530_s2 = inlined_call_operand.vmem [shape: f32[1,8], index: 2, kind: input, shape index: {}]   ;;  %s531_s3 = inlined_call_operand.vmem [shape: f32[64,8], index: 3, kind: output, shape index: {}]  }
   0x1   :  { %v373_v0 = vld [vmem:[%s528_s1 + $0x40] sm:$0xff]   ;;  %v375_v2 = vld [vmem:[%s528_s1 + $0x48] sm:$0xff]   ;;  %v377_v4 = vld [vmem:[%s528_s1 + $0x50] sm:$0xff]  }
   0x2   :  { %v374_v1 = vld [vmem:[%s528_s1] sm:$0xff]   ;;  %317 = vmatprep.subr.bf16.mxu0 %v373_v0  ;;  %357 = vmatprep.subr.bf16.mxu1 %v373_v0  ;;  %v376_v3 = vld [vmem:[%s528_s1 + $0x8] sm:$0xff]   ;;  %v378_v5 = vld [vmem:[%s528_s1 + $0x10] sm:$0xff]  }
   0x3   :  { %318 = vmatpush3.bf16.msra.mxu0 %v374_v1  ;;  %365 = vmatpush3.bf16.msra.mxu1 %v374_v1  ;;  %v379_v6 = vld [vmem:[%s528_s1 + $0x58] sm:$0xff]   ;;  %v381_v8 = vld [vmem:[%s528_s1 + $0x60] sm:$0xff]   ;;  %v383_v10 = vld [vmem:[%s528_s1 + $0x68] sm:$0xff]  }
   0x4   :  { %319 = vmatprep.subr.bf16.mxu0 %v375_v2  ;;  %358 = vmatprep.subr.bf16.mxu1 %v375_v2  ;;  %v380_v7 = vld [vmem:[%s528_s1 + $0x18] sm:$0xff]   ;;  %v382_v9 = vld [vmem:[%s528_s1 + $0x20] sm:$0xff]   ;;  %v384_v13 = vld [vmem:[%s528_s1 + $0x28] sm:$0xff]  }
   0x5   :  { %v391_v11 = vld [vmem:[%s529_s0 + $0x4] ss:$8 sps:$4 sm:$0xff]   ;;  %v385_v14 = vld [vmem:[%s528_s1 + $0x70] sm:$0xff]   ;;  %v387_v16 = vld [vmem:[%s528_s1 + $0x78] sm:$0xff]  }
   0x6   :  { %v394_v12 = vld [vmem:[%s529_s0 + $0x24] ss:$8 sps:$4 sm:$0xff]   ;;  %230 = vmatprep.mubr.bf16.mxu0 %v391_v11  ;;  %v386_v15 = vld [vmem:[%s528_s1 + $0x30] sm:$0xff]   ;;  %v388_v17 = vld [vmem:[%s528_s1 + $0x38] sm:$0xff]  }
   0x7   :  { %320 = vmatpush3.bf16.msra.mxu0 %v376_v3  ;;  %366 = vmatpush3.bf16.msra.mxu1 %v376_v3  ;;  %v389_v18 = vld [vmem:[%s529_s0] ss:$8 sps:$4 sm:$0xff]   ;;  %v395_v20 = vld [vmem:[%s529_s0 + $0x14] ss:$8 sps:$4 sm:$0xff]   ;;  %v399_v22 = vld [vmem:[%s529_s0 + $0x10] ss:$8 sps:$4 sm:$0xff]  }
   0x8   :  { %321 = vmatprep.subr.bf16.mxu0 %v377_v4  ;;  %359 = vmatprep.subr.bf16.mxu1 %v377_v4  ;;  %v392_v19 = vld [vmem:[%s529_s0 + $0x20] ss:$8 sps:$4 sm:$0xff]   ;;  %v397_v21 = vld [vmem:[%s529_s0 + $0x34] ss:$8 sps:$4 sm:$0xff]   ;;  %v400_v23 = vld [vmem:[%s529_s0 + $0x30] ss:$8 sps:$4 sm:$0xff]  }
   0x9   :  { %246 = vmatprep.mubr.bf16.mxu1 %v394_v12  ;;  %v292_v26 = vld [vmem:[%s530_s2] ss:$0 sm:$0xff] }
   0xb   :  { %322 = vmatpush3.bf16.msra.mxu0 %v378_v5  ;;  %367 = vmatpush3.bf16.msra.mxu1 %v378_v5 }
   0xc   :  { %323 = vmatprep.subr.bf16.mxu0 %v379_v6  ;;  %360 = vmatprep.subr.bf16.mxu1 %v379_v6 }
   0xf   :  { %324 = vmatpush3.bf16.msra.mxu0 %v380_v7  ;;  %368 = vmatpush3.bf16.msra.mxu1 %v380_v7 }
  0x10   :  { %325 = vmatprep.subr.bf16.mxu0 %v381_v8  ;;  %361 = vmatprep.subr.bf16.mxu1 %v381_v8 }
  0x13   :  { %326 = vmatpush3.bf16.msra.mxu0 %v382_v9  ;;  %369 = vmatpush3.bf16.msra.mxu1 %v382_v9 }
  0x14   :  { %327 = vmatprep.subr.bf16.mxu0 %v383_v10  ;;  %362 = vmatprep.subr.bf16.mxu1 %v383_v10 }
  0x17   :  { %328 = vmatpush3.bf16.msra.mxu0 %v384_v13  ;;  %370 = vmatpush3.bf16.msra.mxu1 %v384_v13 }
  0x18   :  { %329 = vmatprep.subr.bf16.mxu0 %v385_v14  ;;  %363 = vmatprep.subr.bf16.mxu1 %v385_v14 }
  0x1b   :  { %330 = vmatpush3.bf16.msra.mxu0 %v386_v15  ;;  %371 = vmatpush3.bf16.msra.mxu1 %v386_v15 }
  0x1c   :  { %331 = vmatprep.subr.bf16.mxu0 %v387_v16  ;;  %364 = vmatprep.subr.bf16.mxu1 %v387_v16 }
  0x1f   :  { %332 = vmatpush3.bf16.msra.mxu0 %v388_v17  ;;  %372 = vmatpush3.bf16.msra.mxu1 %v388_v17 }
  0x22   :  { %231 = vmatmul.mubr.bf16.vlgmr.msra.gmra.mrb[0].mxu0 %v389_v18  ;;  %247 = vmatmul.mubr.bf16.vlgmr.msra.gmra.mrb[0].mxu1 %v392_v19 }
  0x23   :  { %238 = vmatprep.mubr.bf16.mxu0 %v395_v20  ;;  %254 = vmatprep.mubr.bf16.mxu1 %v397_v21 }
  0x2a   :  { %239 = vmatmul.mubr.bf16.gmra.mrb[4].mxu0 %v399_v22  ;;  %255 = vmatmul.mubr.bf16.gmra.mrb[4].mxu1 %v400_v23 }
  0xf5   :  { %v333_v24 = vpop.f32.mrb[0].mxu0  ;;  %v345_v25 = vpop.f32.mrb[0].mxu1 }
  0xf6   :  { %v334_v27 = vpop.f32.mrb[1].mxu0  ;;  %v346_v28 = vpop.f32.mrb[1].mxu1 }
  0xf7   :  { %v335_v29 = vadd.f32 %v334_v27, %v333_v24  ;;  %v347_v30 = vadd.f32 %v346_v28, %v345_v25  ;;  %v336_v31 = vpop.f32.mrb[2].mxu0  ;;  %v348_v32 = vpop.f32.mrb[2].mxu1 }
  0xf8   :  { %v337_v33 = vpop.f32.mrb[3].mxu0  ;;  %v349_v34 = vpop.f32.mrb[3].mxu1 }
  0xf9   :  { %v233_v35 = vadd.f32 %v335_v29, %v292_v26  ;;  %v249_v36 = vadd.f32 %v347_v30, %v292_v26  ;;  %v338_v37 = vadd.f32 %v337_v33, %v336_v31  ;;  %v350_v38 = vadd.f32 %v349_v34, %v348_v32 }
  0xfb   :  { %v263_v39 = vmul.f32 0.2, %v233_v35  ;;  %v267_v40 = vmul.f32 0.2, %v249_v36  ;;  %v236_v41 = vadd.f32 %v338_v37, %v292_v26  ;;  %v252_v42 = vadd.f32 %v350_v38, %v292_v26 }
  0xfd   :  { %v271_v43 = vmax.f32 %v233_v35, %v263_v39  ;;  %v275_v44 = vmax.f32 %v249_v36, %v267_v40  ;;  %v264_v45 = vmul.f32 0.2, %v236_v41  ;;  %v268_v46 = vmul.f32 0.2, %v252_v42  ;;  %v339_v47 = vpop.f32.mrb[4].mxu0  ;;  %v351_v48 = vpop.f32.mrb[4].mxu1 }
  0xfe   :  { %v340_v49 = vpop.f32.mrb[5].mxu0  ;;  %v352_v50 = vpop.f32.mrb[5].mxu1 }
  0xff   :  { %280 = vst.msk [vmem:[%s531_s3] sm:$0xff] %vm279_vm0, %v271_v43  ;;  %284 = vst.msk [vmem:[%s531_s3 + $0x20] sm:$0xff] %vm279_vm0, %v275_v44  ;;  %v272_v51 = vmax.f32 %v236_v41, %v264_v45  ;;  %v276_v52 = vmax.f32 %v252_v42, %v268_v46  ;;  %v341_v53 = vadd.f32 %v340_v49, %v339_v47  ;;  %v342_v55 = vpop.f32.mrb[6].mxu0  ;;  %v354_v56 = vpop.f32.mrb[6].mxu1 }
 0x100   :  { %v353_v54 = vadd.f32 %v352_v50, %v351_v48  ;;  %v343_v57 = vpop.f32.mrb[7].mxu0  ;;  %v355_v58 = vpop.f32.mrb[7].mxu1 }
 0x101   :  { %281 = vst.msk [vmem:[%s531_s3 + $0x8] sm:$0xff] %vm279_vm0, %v272_v51  ;;  %285 = vst.msk [vmem:[%s531_s3 + $0x28] sm:$0xff] %vm279_vm0, %v276_v52  ;;  %v241_v59 = vadd.f32 %v341_v53, %v292_v26  ;;  %v344_v61 = vadd.f32 %v343_v57, %v342_v55  ;;  %v356_v62 = vadd.f32 %v355_v58, %v354_v56 }
 0x102   :  { %v257_v60 = vadd.f32 %v353_v54, %v292_v26 }
 0x103   :  { %v265_v63 = vmul.f32 0.2, %v241_v59  ;;  %v244_v1 = vadd.f32 %v344_v61, %v292_v26  ;;  %v260_v2 = vadd.f32 %v356_v62, %v292_v26 }
 0x104   :  { %v269_v0 = vmul.f32 0.2, %v257_v60 }
 0x105   :  { %v273_v3 = vmax.f32 %v241_v59, %v265_v63  ;;  %v266_v5 = vmul.f32 0.2, %v244_v1  ;;  %v270_v6 = vmul.f32 0.2, %v260_v2 }
 0x106   :  { %v277_v4 = vmax.f32 %v257_v60, %v269_v0 }
 0x107   :  { %282 = vst.msk [vmem:[%s531_s3 + $0x10] sm:$0xff] %vm279_vm0, %v273_v3  ;;  %v274_v7 = vmax.f32 %v244_v1, %v266_v5  ;;  %v278_v8 = vmax.f32 %v260_v2, %v270_v6 }
 0x108   :  { %286 = vst.msk [vmem:[%s531_s3 + $0x30] sm:$0xff] %vm279_vm0, %v277_v4 }
 0x109   :  { %283 = vst.msk [vmem:[%s531_s3 + $0x18] sm:$0xff] %vm279_vm0, %v274_v7  ;;  %287 = vst.msk [vmem:[%s531_s3 + $0x38] sm:$0xff] %vm279_vm0, %v278_v8 }

// kernel: backbone_forward.14
= control target key start
LH: loop header
LB: loop body
LE: loop exit
PB: predicated region body
PF: predicated region fallthrough
CT: control target
= control target key end

     0   :  { %s1581_s12 = smov 0   ;;  %s1857_s0 = inlined_call_operand.vmem [shape: bf16[512,384], index: 0, kind: input, shape index: {}]   ;;  %s1858_s1 = inlined_call_operand.vmem [shape: bf16[384,4], index: 1, kind: input, shape index: {}]   ;;  %s1859_s2 = inlined_call_operand.vmem [shape: f32[1,4], index: 2, kind: input, shape index: {}]   ;;  %s1860_s3 = inlined_call_operand.vmem [shape: f32[512,4], index: 3, kind: output, shape index: {}]  }
   0x1 LB: > { %s1172_s13 = sadd.s32 4294967295, %s1559_s12   ;;  %p1176_p0 = scmp.ge.s32.totalorder %s1559_s12, 1  ;;  %s1559_s12 = sphi %s1581_s12, %s13_s12  }
   0x2   : > { %p139_p1 = scmp.lt.s32.totalorder %s1559_s12, 3 }
   0x4   : > { %p140_p2 = pnand %p1176_p0, %p139_p1 }
   0x5   : > { %v1465_v0 = vld [vmem:[%s1858_s1 + $0x40] sm:$0xff] (!%p140_p2)   ;;  %s1177_s16 = sshll.u32 (!%p140_p2), %s1172_s13, 5  ;;  %v1467_v2 = vld [vmem:[%s1858_s1 + $0x48] sm:$0xff] (!%p140_p2)   ;;  %v1469_v4 = vld [vmem:[%s1858_s1 + $0x50] sm:$0xff] (!%p140_p2)   ;;  %vm1083_vm0 = vcmask (!%p140_p2), 31744  }
   0x6   : > { %143 = sbr.rel (%p140_p2) target bundleno = 352 (0x160), region = 32  ;;  %v1466_v1 = vld [vmem:[%s1858_s1] sm:$0xff] (!%p140_p2)   ;;  %1256 = vmatprep.subr.bf16.mxu0 (!%p140_p2), %v1465_v0  ;;  %1440 = vmatprep.subr.bf16.mxu1 (!%p140_p2), %v1465_v0  ;;  %p165_p3 = scmp.lt.s32.totalorder (!%p140_p2), %s1177_s16, 63  ;;  %v1468_v3 = vld [vmem:[%s1858_s1 + $0x8] sm:$0xff] (!%p140_p2)   ;;  %v1470_v5 = vld [vmem:[%s1858_s1 + $0x10] sm:$0xff] (!%p140_p2)  }
   0x7   : > { %1257 = vmatpush3.bf16.msra.mxu0 (!%p140_p2), %v1466_v1  ;;  %1448 = vmatpush3.bf16.msra.mxu1 (!%p140_p2), %v1466_v1  ;;  %v1471_v6 = vld [vmem:[%s1858_s1 + $0x58] sm:$0xff] (!%p140_p2)   ;;  %v1473_v8 = vld [vmem:[%s1858_s1 + $0x60] sm:$0xff] (!%p140_p2)   ;;  %v1475_v10 = vld [vmem:[%s1858_s1 + $0x68] sm:$0xff] (!%p140_p2)  }
   0x8   : > { %1258 = vmatprep.subr.bf16.mxu0 (!%p140_p2), %v1467_v2  ;;  %1441 = vmatprep.subr.bf16.mxu1 (!%p140_p2), %v1467_v2  ;;  %v1472_v7 = vld [vmem:[%s1858_s1 + $0x18] sm:$0xff] (!%p140_p2)   ;;  %v1474_v9 = vld [vmem:[%s1858_s1 + $0x20] sm:$0xff] (!%p140_p2)   ;;  %v1476_v13 = vld [vmem:[%s1858_s1 + $0x28] sm:$0xff] (!%p140_p2)  }
   0x9   : > { %v1477_v14 = vld [vmem:[%s1858_s1 + $0x70] sm:$0xff] (!%p140_p2)   ;;  %v1479_v16 = vld [vmem:[%s1858_s1 + $0x78] sm:$0xff] (!%p140_p2)   ;;  %v1487_v18 = vld [vmem:[%s1858_s1 + $0x80] sm:$0xff] (!%p140_p2)  }
   0xa   : > { %v1478_v15 = vld [vmem:[%s1858_s1 + $0x30] sm:$0xff] (!%p140_p2)   ;;  %v1480_v17 = vld [vmem:[%s1858_s1 + $0x38] sm:$0xff] (!%p140_p2)   ;;  %v1488_v22 = vld [vmem:[%s1858_s1 + $0x88] sm:$0xff] (!%p140_p2)  }
   0xb   : > { %1259 = vmatpush3.bf16.msra.mxu0 (!%p140_p2), %v1468_v3  ;;  %1449 = vmatpush3.bf16.msra.mxu1 (!%p140_p2), %v1468_v3  ;;  %v1495_v25 = vld [vmem:[%s1858_s1 + $0x90] sm:$0xff] (!%p140_p2)   ;;  %v1496_v27 = vld [vmem:[%s1858_s1 + $0x98] sm:$0xff] (!%p140_p2)   ;;  %v1503_v30 = vld [vmem:[%s1858_s1 + $0xa0] sm:$0xff] (!%p140_p2)  }
   0xc   : > { %1260 = vmatprep.subr.bf16.mxu0 (!%p140_p2), %v1469_v4  ;;  %1442 = vmatprep.subr.bf16.mxu1 (!%p140_p2), %v1469_v4  ;;  %v1504_v33 = vld [vmem:[%s1858_s1 + $0xa8] sm:$0xff] (!%p140_p2)   ;;  %v1511_v36 = vld [vmem:[%s1858_s1 + $0xb0] sm:$0xff] (!%p140_p2)   ;;  %v1512_v40 = vld [vmem:[%s1858_s1 + $0xb8] sm:$0xff] (!%p140_p2)  }
   0xd   : > { %s1862_s16 = smov (!%p165_p3, %s1177_s16), 63 }
   0xe   : > { %s1456_s29 = smul.u32 12, %s1862_s16  ;;  %s1180_s19 = sshll.u32 %s1862_s16, 3 }
   0xf   : > { %1261 = vmatpush3.bf16.msra.mxu0 %v1470_v5  ;;  %1450 = vmatpush3.bf16.msra.mxu1 %v1470_v5  ;;  %s1746_s22 = scalar_lea.vmem %s1860_s3, %s1180_s19 }
  0x10   : > { %1262 = vmatprep.subr.bf16.mxu0 %v1471_v6  ;;  %1443 = vmatprep.subr.bf16.mxu1 %v1471_v6  ;;  %s1622_s9 = scalar_lea.vmem %s1857_s0, %s1456_s29 }
  0x11   : > { %v1483_v11 = vld [vmem:[%s1622_s9 + $0x4] ss:$12 sps:$4 sm:$0xff]   ;;  %v1481_v19 = vld [vmem:[%s1622_s9] ss:$12 sps:$4 sm:$0xff]   ;;  %v1489_v21 = vld [vmem:[%s1622_s9 + $0x1c] ss:$12 sps:$4 sm:$0xff]  }
  0x12   : > { %v1486_v12 = vld [vmem:[%s1622_s9 + $0x124] ss:$12 sps:$4 sm:$0xff]   ;;  %729 = vmatprep.mubr.bf16.mxu0 %v1483_v11  ;;  %v1484_v20 = vld [vmem:[%s1622_s9 + $0x120] ss:$12 sps:$4 sm:$0xff]   ;;  %v1491_v23 = vld [vmem:[%s1622_s9 + $0x13c] ss:$12 sps:$4 sm:$0xff]  }
  0x13   : > { %1263 = vmatpush3.bf16.msra.mxu0 %v1472_v7  ;;  %1451 = vmatpush3.bf16.msra.mxu1 %v1472_v7  ;;  %v1493_v24 = vld [vmem:[%s1622_s9 + $0x18] ss:$12 sps:$4 sm:$0xff]   ;;  %v1497_v28 = vld [vmem:[%s1622_s9 + $0x34] ss:$12 sps:$4 sm:$0xff]   ;;  %v1501_v31 = vld [vmem:[%s1622_s9 + $0x30] ss:$12 sps:$4 sm:$0xff]  }
  0x14   : > { %1264 = vmatprep.subr.bf16.mxu0 %v1473_v8  ;;  %1444 = vmatprep.subr.bf16.mxu1 %v1473_v8  ;;  %v1494_v26 = vld [vmem:[%s1622_s9 + $0x138] ss:$12 sps:$4 sm:$0xff]   ;;  %v1499_v29 = vld [vmem:[%s1622_s9 + $0x154] ss:$12 sps:$4 sm:$0xff]   ;;  %v1502_v32 = vld [vmem:[%s1622_s9 + $0x150] ss:$12 sps:$4 sm:$0xff]  }
  0x15   : > { %825 = vmatprep.mubr.bf16.mxu1 %v1486_v12  ;;  %v1505_v34 = vld [vmem:[%s1622_s9 + $0x4c] ss:$12 sps:$4 sm:$0xff]   ;;  %v1509_v37 = vld [vmem:[%s1622_s9 + $0x48] ss:$12 sps:$4 sm:$0xff]   ;;  %v1513_v39 = vld [vmem:[%s1622_s9 + $0x64] ss:$12 sps:$4 sm:$0xff]  }
  0x16   : > { %v1507_v35 = vld [vmem:[%s1622_s9 + $0x16c] ss:$12 sps:$4 sm:$0xff]   ;;  %v1510_v38 = vld [vmem:[%s1622_s9 + $0x168] ss:$12 sps:$4 sm:$0xff]   ;;  %v1522_v47 = vld [vmem:[%s1622_s9 + $0x50] ss:$12 sps:$4 sm:$0xff]  }
  0x17   : > { %1265 = vmatpush3.bf16.msra.mxu0 %v1474_v9  ;;  %1452 = vmatpush3.bf16.msra.mxu1 %v1474_v9  ;;  %v1515_v41 = vld [vmem:[%s1622_s9 + $0x8] ss:$12 sps:$4 sm:$0xff]   ;;  %v1516_v42 = vld [vmem:[%s1622_s9 + $0x60] ss:$12 sps:$4 sm:$0xff]   ;;  %v1520_v45 = vld [vmem:[%s1622_s9 + $0x38] ss:$12 sps:$4 sm:$0xff]  }
  0x18   : > { %1266 = vmatprep.subr.bf16.mxu0 %v1475_v10  ;;  %1445 = vmatprep.subr.bf16.mxu1 %v1475_v10  ;;  %v1517_v43 = vld [vmem:[%s1622_s9 + $0x20] ss:$12 sps:$4 sm:$0xff]   ;;  %v1518_v44 = vld [vmem:[%s1622_s9 + $0x7c] ss:$12 sps:$4 sm:$0xff]   ;;  %v1521_v46 = vld [vmem:[%s1622_s9 + $0x78] ss:$12 sps:$4 sm:$0xff]  }
  0x19   : > { %v1523_v48 = vld [vmem:[%s1622_s9 + $0x94] ss:$12 sps:$4 sm:$0xff]   ;;  %v1526_v50 = vld [vmem:[%s1622_s9 + $0x90] ss:$12 sps:$4 sm:$0xff]   ;;  %v1528_v52 = vld [vmem:[%s1622_s9 + $0xac] ss:$12 sps:$4 sm:$0xff]  }
  0x1a   : > { %v1525_v49 = vld [vmem:[%s1622_s9 + $0x68] ss:$12 sps:$4 sm:$0xff]   ;;  %v1527_v51 = vld [vmem:[%s1622_s9 + $0x80] ss:$12 sps:$4 sm:$0xff]   ;;  %v1530_v53 = vld [vmem:[%s1622_s9 + $0x98] ss:$12 sps:$4 sm:$0xff]  }
  0x1b   : > { %1267 = vmatpush3.bf16.msra.mxu0 %v1476_v13  ;;  %1453 = vmatpush3.bf16.msra.mxu1 %v1476_v13  ;;  %v1531_v54 = vld [vmem:[%s1622_s9 + $0xa8] ss:$12 sps:$4 sm:$0xff]   ;;  %v1532_v55 = vld [vmem:[%s1622_s9 + $0xb0] ss:$12 sps:$4 sm:$0xff]   ;;  %v1536_v58 = vld [vmem:[%s1622_s9 + $0xc0] ss:$12 sps:$4 sm:$0xff]  }
  0x1c   : > { %1268 = vmatprep.subr.bf16.mxu0 %v1477_v14  ;;  %1446 = vmatprep.subr.bf16.mxu1 %v1477_v14  ;;  %v1533_v56 = vld [vmem:[%s1622_s9 + $0xc4] ss:$12 sps:$4 sm:$0xff]   ;;  %v1535_v57 = vld [vmem:[%s1622_s9 + $0xc8] ss:$12 sps:$4 sm:$0xff]   ;;  %v1537_v59 = vld [vmem:[%s1622_s9 + $0xe0] ss:$12 sps:$4 sm:$0xff]  }
  0x1d   : > { %v1538_v60 = vld [vmem:[%s1622_s9 + $0xdc] ss:$12 sps:$4 sm:$0xff]   ;;  %v1540_v61 = vld [vmem:[%s1622_s9 + $0xf8] ss:$12 sps:$4 sm:$0xff]   ;;  %v1543_v0 = vld [vmem:[%s1622_s9 + $0xf4] ss:$12 sps:$4 sm:$0xff]  }
  0x1e   : > { %v1541_v62 = vld [vmem:[%s1622_s9 + $0xd8] ss:$12 sps:$4 sm:$0xff]   ;;  %v1542_v63 = vld [vmem:[%s1622_s9 + $0x110] ss:$12 sps:$4 sm:$0xff]   ;;  %v1545_v1 = vld [vmem:[%s1622_s9 + $0x128] ss:$12 sps:$4 sm:$0xff]  }
  0x1f   : > { %1269 = vmatpush3.bf16.msra.mxu0 %v1478_v15  ;;  %1454 = vmatpush3.bf16.msra.mxu1 %v1478_v15  ;;  %v1546_v2 = vld [vmem:[%s1622_s9 + $0xf0] ss:$12 sps:$4 sm:$0xff]   ;;  %v1547_v3 = vld [vmem:[%s1622_s9 + $0x140] ss:$12 sps:$4 sm:$0xff]   ;;  %v1550_v5 = vld [vmem:[%s1622_s9 + $0x158] ss:$12 sps:$4 sm:$0xff]  }
  0x20   : > { %1270 = vmatprep.subr.bf16.mxu0 %v1479_v16  ;;  %1447 = vmatprep.subr.bf16.mxu1 %v1479_v16  ;;  %v1548_v4 = vld [vmem:[%s1622_s9 + $0x10c] ss:$12 sps:$4 sm:$0xff]   ;;  %v1551_v6 = vld [vmem:[%s1622_s9 + $0x108] ss:$12 sps:$4 sm:$0xff]   ;;  %v1552_v7 = vld [vmem:[%s1622_s9 + $0x170] ss:$12 sps:$4 sm:$0xff]  }
  0x23   : > { %1271 = vmatpush3.bf16.msra.mxu0 %v1480_v17  ;;  %1455 = vmatpush3.bf16.msra.mxu1 %v1480_v17 }
  0x24   : > { %1392 = vmatprep.subr.bf16.mxu1 %v1487_v18 }
  0x26   : > { %730 = vmatmul.mubr.bf16.vlgmr.msra.gmra.mrb[0].mxu0 %v1481_v19  ;;  %826 = vmatmul.mubr.bf16.vlgmr.msra.gmra.mrb[0].mxu1 %v1484_v20 }
  0x27   : > { %1393 = vmatpush3.bf16.msra.mxu1 %v1487_v18  ;;  %737 = vmatprep.mubr.bf16.mxu0 %v1489_v21 }
  0x28   : > { %1394 = vmatprep.subr.bf16.mxu1 %v1488_v22  ;;  %833 = vmatprep.mubr.bf16.mxu1 %v1491_v23 }
  0x2b   : > { %1395 = vmatpush3.bf16.msra.mxu1 %v1488_v22 }
  0x2c   : > { %1396 = vmatprep.subr.bf16.mxu1 %v1495_v25 }
  0x2e   : > { %738 = vmatmul.mubr.bf16.gmra.mrb[4].mxu0 %v1493_v24  ;;  %834 = vmatmul.mubr.bf16.gmra.mrb[4].mxu1 %v1494_v26 }
  0x2f   : > { %1397 = vmatpush3.bf16.msra.mxu1 %v1495_v25  ;;  %745 = vmatprep.mubr.bf16.mxu0 %v1497_v28 }
  0x30   : > { %1398 = vmatprep.subr.bf16.mxu1 %v1496_v27  ;;  %841 = vmatprep.mubr.bf16.mxu1 %v1499_v29 }
  0x33   : > { %1399 = vmatpush3.bf16.msra.mxu1 %v1496_v27 }
  0x34   : > { %1400 = vmatprep.subr.bf16.mxu1 %v1503_v30 }
  0x36   : > { %746 = vmatmul.mubr.bf16.gmra.mrb[8].mxu0 %v1501_v31  ;;  %842 = vmatmul.mubr.bf16.gmra.mrb[8].mxu1 %v1502_v32 }
  0x37   : > { %1401 = vmatpush3.bf16.msra.mxu1 %v1503_v30  ;;  %753 = vmatprep.mubr.bf16.mxu0 %v1505_v34 }
  0x38   : > { %1402 = vmatprep.subr.bf16.mxu1 %v1504_v33  ;;  %849 = vmatprep.mubr.bf16.mxu1 %v1507_v35 }
  0x3b   : > { %1403 = vmatpush3.bf16.msra.mxu1 %v1504_v33 }
  0x3c   : > { %1404 = vmatprep.subr.bf16.mxu1 %v1511_v36 }
  0x3e   : > { %754 = vmatmul.mubr.bf16.gmra.mrb[12].mxu0 %v1509_v37  ;;  %850 = vmatmul.mubr.bf16.gmra.mrb[12].mxu1 %v1510_v38 }
  0x3f   : > { %1405 = vmatpush3.bf16.msra.mxu1 %v1511_v36  ;;  %761 = vmatprep.mubr.bf16.mxu0 %v1513_v39 }
  0x40   : > { %1406 = vmatprep.subr.bf16.mxu1 %v1512_v40  ;;  %1408 = vmatprep.mubr.bf16.mxu1 %v1515_v41 }
  0x43   : > { %1407 = vmatpush3.bf16.msra.mxu1 %v1512_v40 }
  0x46   : > { %762 = vmatmul.mubr.bf16.gmra.mrb[16].mxu0 %v1516_v42  ;;  %1409 = vmatmul.mubr.bf16.vlgmr.msra.gmra.mrb[16].mxu1 %v1517_v43 }
  0x47   : > { %769 = vmatprep.mubr.bf16.mxu0 %v1518_v44  ;;  %1412 = vmatprep.mubr.bf16.mxu1 %v1520_v45 }
  0x4e   : > { %770 = vmatmul.mubr.bf16.gmra.mrb[20].mxu0 %v1521_v46  ;;  %1413 = vmatmul.mubr.bf16.gmra.mrb[20].mxu1 %v1522_v47 }
  0x4f   : > { %777 = vmatprep.mubr.bf16.mxu0 %v1523_v48  ;;  %1416 = vmatprep.mubr.bf16.mxu1 %v1525_v49 }
  0x56   : > { %778 = vmatmul.mubr.bf16.gmra.mrb[24].mxu0 %v1526_v50  ;;  %1417 = vmatmul.mubr.bf16.gmra.mrb[24].mxu1 %v1527_v51 }
  0x57   : > { %785 = vmatprep.mubr.bf16.mxu0 %v1528_v52  ;;  %1420 = vmatprep.mubr.bf16.mxu1 %v1530_v53 }
  0x5e   : > { %786 = vmatmul.mubr.bf16.gmra.mrb[28].mxu0 %v1531_v54  ;;  %1421 = vmatmul.mubr.bf16.gmra.mrb[28].mxu1 %v1532_v55 }
  0x5f   : > { %793 = vmatprep.mubr.bf16.mxu0 %v1533_v56  ;;  %1424 = vmatprep.mubr.bf16.mxu1 %v1535_v57  ;;  %v1736_v56 = vld [vmem:[%s1859_s2] ss:$0 sm:$0xff] }
  0x66   : > { %794 = vmatmul.mubr.bf16.gmra.mrb[32].mxu0 %v1536_v58  ;;  %1425 = vmatmul.mubr.bf16.gmra.mrb[32].mxu1 %v1537_v59 }
  0x67   : > { %801 = vmatprep.mubr.bf16.mxu0 %v1538_v60  ;;  %1428 = vmatprep.mubr.bf16.mxu1 %v1540_v61 }
  0x6e   : > { %802 = vmatmul.mubr.bf16.gmra.mrb[36].mxu0 %v1541_v62  ;;  %1429 = vmatmul.mubr.bf16.gmra.mrb[36].mxu1 %v1542_v63 }
  0x6f   : > { %809 = vmatprep.mubr.bf16.mxu0 %v1543_v0  ;;  %1432 = vmatprep.mubr.bf16.mxu1 %v1545_v1 }
  0x76   : > { %810 = vmatmul.mubr.bf16.gmra.mrb[40].mxu0 %v1546_v2  ;;  %1433 = vmatmul.mubr.bf16.gmra.mrb[40].mxu1 %v1547_v3 }
  0x77   : > { %817 = vmatprep.mubr.bf16.mxu0 %v1548_v4  ;;  %1436 = vmatprep.mubr.bf16.mxu1 %v1550_v5 }
  0x7e   : > { %818 = vmatmul.mubr.bf16.gmra.mrb[44].mxu0 %v1551_v6  ;;  %1437 = vmatmul.mubr.bf16.gmra.mrb[44].mxu1 %v1552_v7 }
  0xf9   : > { %v1272_v8 = vpop.f32.mrb[0].mxu0  ;;  %v1344_v9 = vpop.f32.mrb[0].mxu1 }
  0xfa   : > { %v1273_v10 = vpop.f32.mrb[1].mxu0  ;;  %v1345_v11 = vpop.f32.mrb[1].mxu1 }
  0xfb   : > { %v1274_v12 = vadd.f32 %v1273_v10, %v1272_v8  ;;  %v1275_v13 = vpop.f32.mrb[2].mxu0  ;;  %v1717_v14 = vadd.f32 %v1345_v11, %v1344_v9  ;;  %v1347_v15 = vpop.f32.mrb[2].mxu1 }
  0xfc   : > { %v1276_v16 = vpop.f32.mrb[3].mxu0  ;;  %v1348_v17 = vpop.f32.mrb[3].mxu1 }
  0xfd   : > { %v1277_v18 = vadd.f32 %v1276_v16, %v1275_v13  ;;  %v1719_v19 = vadd.f32 %v1348_v17, %v1347_v15  ;;  %v732_v60 = vadd.f32 %v1274_v12, %v1736_v56 }
  0xff   : > { %v735_v5 = vadd.f32 %v1277_v18, %v1736_v56 }
 0x101   : > { %v1278_v20 = vpop.f32.mrb[4].mxu0  ;;  %v1350_v21 = vpop.f32.mrb[4].mxu1 }
 0x102   : > { %v1279_v22 = vpop.f32.mrb[5].mxu0  ;;  %v1351_v23 = vpop.f32.mrb[5].mxu1 }
 0x103   : > { %v1280_v24 = vadd.f32 %v1279_v22, %v1278_v20  ;;  %v1281_v25 = vpop.f32.mrb[6].mxu0  ;;  %v1721_v26 = vadd.f32 %v1351_v23, %v1350_v21  ;;  %v1353_v27 = vpop.f32.mrb[6].mxu1 }
 0x104   : > { %v1282_v28 = vpop.f32.mrb[7].mxu0  ;;  %v1354_v29 = vpop.f32.mrb[7].mxu1 }
 0x105   : > { %v1283_v30 = vadd.f32 %v1282_v28, %v1281_v25  ;;  %v1723_v31 = vadd.f32 %v1354_v29, %v1353_v27  ;;  %v740_v57 = vadd.f32 %v1280_v24, %v1736_v56 }
 0x107   : > { %v743_v0 = vadd.f32 %v1283_v30, %v1736_v56 }
 0x109   : > { %v1284_v32 = vpop.f32.mrb[8].mxu0  ;;  %v1356_v33 = vpop.f32.mrb[8].mxu1 }
 0x10a   : > { %v1285_v34 = vpop.f32.mrb[9].mxu0  ;;  %v1357_v35 = vpop.f32.mrb[9].mxu1 }
 0x10b   : > { %v1286_v36 = vadd.f32 %v1285_v34, %v1284_v32  ;;  %v1287_v37 = vpop.f32.mrb[10].mxu0  ;;  %v1725_v38 = vadd.f32 %v1357_v35, %v1356_v33  ;;  %v1359_v39 = vpop.f32.mrb[10].mxu1 }
 0x10c   : > { %v1288_v40 = vpop.f32.mrb[11].mxu0  ;;  %v1360_v41 = vpop.f32.mrb[11].mxu1 }
 0x10d   : > { %v1289_v42 = vadd.f32 %v1288_v40, %v1287_v37  ;;  %v1727_v43 = vadd.f32 %v1360_v41, %v1359_v39  ;;  %v748_v24 = vadd.f32 %v1286_v36, %v1736_v56 }
 0x10f   : > { %v751_v35 = vadd.f32 %v1289_v42, %v1736_v56 }
 0x111   : > { %v1290_v44 = vpop.f32.mrb[12].mxu0  ;;  %v1362_v45 = vpop.f32.mrb[12].mxu1 }
 0x112   : > { %v1291_v46 = vpop.f32.mrb[13].mxu0  ;;  %v1363_v47 = vpop.f32.mrb[13].mxu1 }
 0x113   : > { %v1292_v48 = vadd.f32 %v1291_v46, %v1290_v44  ;;  %v1293_v49 = vpop.f32.mrb[14].mxu0  ;;  %v1729_v50 = vadd.f32 %v1363_v47, %v1362_v45  ;;  %v1365_v51 = vpop.f32.mrb[14].mxu1 }
 0x114   : > { %v1294_v52 = vpop.f32.mrb[15].mxu0  ;;  %v1366_v53 = vpop.f32.mrb[15].mxu1 }
 0x115   : > { %v1295_v54 = vadd.f32 %v1294_v52, %v1293_v49  ;;  %v1731_v55 = vadd.f32 %v1366_v53, %v1365_v51  ;;  %v756_v20 = vadd.f32 %v1292_v48, %v1736_v56 }
 0x117   : > { %v759_v29 = vadd.f32 %v1295_v54, %v1736_v56 }
 0x119   : > { %v1296_v58 = vpop.f32.mrb[16].mxu0  ;;  %v1410_v59 = vpop.f32.mrb[16].mxu1 }
 0x11a   : > { %v901_v61 = vadd.f32 %v1410_v59, %v740_v57  ;;  %v1297_v62 = vpop.f32.mrb[17].mxu0  ;;  %v892_v63 = vpop.f32.mrb[17].mxu1 }
 0x11b   : > { %v1298_v1 = vadd.f32 %v1297_v62, %v1296_v58  ;;  %v893_v2 = vadd.f32 %v892_v63, %v732_v60  ;;  %v1299_v3 = vpop.f32.mrb[18].mxu0  ;;  %v1411_v4 = vpop.f32.mrb[18].mxu1 }
 0x11c   : > { %v1021_v6 = vmul.f32 0.2, %v901_v61  ;;  %v904_v7 = vadd.f32 %v1411_v4, %v743_v0  ;;  %v1300_v8 = vpop.f32.mrb[19].mxu0  ;;  %v895_v9 = vpop.f32.mrb[19].mxu1 }
 0x11d   : > { %v1019_v10 = vmul.f32 0.2, %v893_v2  ;;  %v1301_v11 = vadd.f32 %v1300_v8, %v1299_v3  ;;  %v896_v12 = vadd.f32 %v895_v9, %v735_v5  ;;  %v764_v57 = vadd.f32 %v1298_v1, %v1736_v56 }
 0x11e   : > { %v1053_v13 = vmax.f32 %v901_v61, %v1021_v6  ;;  %v1022_v15 = vmul.f32 0.2, %v904_v7 }
 0x11f   : > { %v1051_v16 = vmax.f32 %v893_v2, %v1019_v10  ;;  %v1020_v17 = vmul.f32 0.2, %v896_v12  ;;  %v767_v3 = vadd.f32 %v1301_v11, %v1736_v56 }
 0x120   : > { %1086 = vst.msk [vmem:[%s1746_s22 + $0x10] sm:$0xff] %vm1083_vm0, %v1053_v13  ;;  %v1054_v18 = vmax.f32 %v904_v7, %v1022_v15 }
 0x121   : > { %1084 = vst.msk [vmem:[%s1746_s22] sm:$0xff] %vm1083_vm0, %v1051_v16  ;;  %v1052_v21 = vmax.f32 %v896_v12, %v1020_v17  ;;  %v1302_v22 = vpop.f32.mrb[20].mxu0  ;;  %v1414_v23 = vpop.f32.mrb[20].mxu1 }
 0x122   : > { %1087 = vst.msk [vmem:[%s1746_s22 + $0x18] sm:$0xff] %vm1083_vm0, %v1054_v18  ;;  %v917_v25 = vadd.f32 %v1414_v23, %v756_v20  ;;  %v1303_v27 = vpop.f32.mrb[21].mxu0  ;;  %v908_v28 = vpop.f32.mrb[21].mxu1 }
 0x123   : > { %1085 = vst.msk [vmem:[%s1746_s22 + $0x8] sm:$0xff] %vm1083_vm0, %v1052_v21  ;;  %v1304_v30 = vadd.f32 %v1303_v27, %v1302_v22  ;;  %v909_v32 = vadd.f32 %v908_v28, %v748_v24  ;;  %v1305_v33 = vpop.f32.mrb[22].mxu0  ;;  %v1415_v34 = vpop.f32.mrb[22].mxu1 }
 0x124   : > { %v1025_v37 = vmul.f32 0.2, %v917_v25  ;;  %v920_v39 = vadd.f32 %v1415_v34, %v759_v29  ;;  %v1306_v36 = vpop.f32.mrb[23].mxu0  ;;  %v911_v40 = vpop.f32.mrb[23].mxu1 }
 0x125   : > { %v1023_v41 = vmul.f32 0.2, %v909_v32  ;;  %v1307_v44 = vadd.f32 %v1306_v36, %v1305_v33  ;;  %v912_v45 = vadd.f32 %v911_v40, %v751_v35  ;;  %v772_v52 = vadd.f32 %v1304_v30, %v1736_v56 }
 0x126   : > { %v1057_v46 = vmax.f32 %v917_v25, %v1025_v37  ;;  %v1026_v47 = vmul.f32 0.2, %v920_v39 }
 0x127   : > { %v1055_v48 = vmax.f32 %v909_v32, %v1023_v41  ;;  %v1024_v49 = vmul.f32 0.2, %v912_v45  ;;  %v775_v61 = vadd.f32 %v1307_v44, %v1736_v56 }
 0x128   : > { %1090 = vst.msk [vmem:[%s1746_s22 + $0x30] sm:$0xff] %vm1083_vm0, %v1057_v46  ;;  %v1058_v51 = vmax.f32 %v920_v39, %v1026_v47 }
 0x129   : > { %1088 = vst.msk [vmem:[%s1746_s22 + $0x20] sm:$0xff] %vm1083_vm0, %v1055_v48  ;;  %v1056_v42 = vmax.f32 %v912_v45, %v1024_v49  ;;  %v1308_v53 = vpop.f32.mrb[24].mxu0  ;;  %v1418_v54 = vpop.f32.mrb[24].mxu1 }
 0x12a   : > { %1091 = vst.msk [vmem:[%s1746_s22 + $0x38] sm:$0xff] %vm1083_vm0, %v1058_v51  ;;  %v933_v58 = vadd.f32 %v1418_v54, %v772_v52  ;;  %v1309_v59 = vpop.f32.mrb[25].mxu0  ;;  %v924_v60 = vpop.f32.mrb[25].mxu1 }
 0x12b   : > { %1089 = vst.msk [vmem:[%s1746_s22 + $0x28] sm:$0xff] %vm1083_vm0, %v1056_v42  ;;  %v1310_v62 = vadd.f32 %v1309_v59, %v1308_v53  ;;  %v925_v63 = vadd.f32 %v924_v60, %v764_v57  ;;  %v1311_v0 = vpop.f32.mrb[26].mxu0  ;;  %v1419_v2 = vpop.f32.mrb[26].mxu1 }
 0x12c   : > { %v1029_v4 = vmul.f32 0.2, %v933_v58  ;;  %v936_v5 = vadd.f32 %v1419_v2, %v775_v61  ;;  %v1312_v1 = vpop.f32.mrb[27].mxu0  ;;  %v927_v6 = vpop.f32.mrb[27].mxu1 }
 0x12d   : > { %v1027_v7 = vmul.f32 0.2, %v925_v63  ;;  %v1313_v8 = vadd.f32 %v1312_v1, %v1311_v0  ;;  %v928_v9 = vadd.f32 %v927_v6, %v767_v3  ;;  %v780_v20 = vadd.f32 %v1310_v62, %v1736_v56 }
 0x12e   : > { %v1061_v10 = vmax.f32 %v933_v58, %v1029_v4  ;;  %v1030_v12 = vmul.f32 0.2, %v936_v5 }
 0x12f   : > { %v1059_v13 = vmax.f32 %v925_v63, %v1027_v7  ;;  %v1028_v15 = vmul.f32 0.2, %v928_v9  ;;  %v783_v28 = vadd.f32 %v1313_v8, %v1736_v56 }
 0x130   : > { %1094 = vst.msk [vmem:[%s1746_s22 + $0x50] sm:$0xff] %vm1083_vm0, %v1061_v10  ;;  %v1062_v16 = vmax.f32 %v936_v5, %v1030_v12 }
 0x131   : > { %1092 = vst.msk [vmem:[%s1746_s22 + $0x40] sm:$0xff] %vm1083_vm0, %v1059_v13  ;;  %v1060_v17 = vmax.f32 %v928_v9, %v1028_v15  ;;  %v1314_v11 = vpop.f32.mrb[28].mxu0  ;;  %v1422_v18 = vpop.f32.mrb[28].mxu1 }
 0x132   : > { %1095 = vst.msk [vmem:[%s1746_s22 + $0x58] sm:$0xff] %vm1083_vm0, %v1062_v16  ;;  %v1315_v21 = vpop.f32.mrb[29].mxu0  ;;  %v940_v22 = vpop.f32.mrb[29].mxu1 }
 0x133   : > { %1093 = vst.msk [vmem:[%s1746_s22 + $0x48] sm:$0xff] %vm1083_vm0, %v1060_v17  ;;  %v1316_v23 = vadd.f32 %v1315_v21, %v1314_v11  ;;  %v941_v24 = vadd.f32 %v940_v22, %v780_v20  ;;  %v1317_v25 = vpop.f32.mrb[30].mxu0  ;;  %v1423_v27 = vpop.f32.mrb[30].mxu1  ;;  %v836_v20 = vadd.f32 %v1721_v26, %v1736_v56 }
 0x134   : > { %v1318_v29 = vpop.f32.mrb[31].mxu0  ;;  %v943_v30 = vpop.f32.mrb[31].mxu1 }
 0x135   : > { %v788_v32 = vadd.f32 %v1316_v23, %v1736_v56  ;;  %v1031_v33 = vmul.f32 0.2, %v941_v24  ;;  %v1319_v34 = vadd.f32 %v1318_v29, %v1317_v25  ;;  %v944_v35 = vadd.f32 %v943_v30, %v783_v28 }
 0x136   : > { %v828_v25 = vadd.f32 %v1717_v14, %v1736_v56  ;;  %v839_v30 = vadd.f32 %v1723_v31, %v1736_v56  ;;  %v831_v14 = vadd.f32 %v1719_v19, %v1736_v56 }
 0x137   : > { %v949_v37 = vadd.f32 %v1422_v18, %v788_v32  ;;  %v1063_v39 = vmax.f32 %v941_v24, %v1031_v33  ;;  %v791_v36 = vadd.f32 %v1319_v34, %v1736_v56  ;;  %v1032_v40 = vmul.f32 0.2, %v944_v35 }
 0x139   : > { %v1033_v41 = vmul.f32 0.2, %v949_v37  ;;  %1096 = vst.msk [vmem:[%s1746_s22 + $0x60] sm:$0xff] %vm1083_vm0, %v1063_v39  ;;  %v952_v44 = vadd.f32 %v1423_v27, %v791_v36  ;;  %v1064_v45 = vmax.f32 %v944_v35, %v1032_v40  ;;  %v1320_v46 = vpop.f32.mrb[32].mxu0  ;;  %v1426_v47 = vpop.f32.mrb[32].mxu1 }
 0x13a   : > { %v1321_v48 = vpop.f32.mrb[33].mxu0  ;;  %v956_v49 = vpop.f32.mrb[33].mxu1 }
 0x13b   : > { %v1065_v51 = vmax.f32 %v949_v37, %v1033_v41  ;;  %v1034_v52 = vmul.f32 0.2, %v952_v44  ;;  %1097 = vst.msk [vmem:[%s1746_s22 + $0x68] sm:$0xff] %vm1083_vm0, %v1064_v45  ;;  %v1322_v42 = vadd.f32 %v1321_v48, %v1320_v46  ;;  %v1323_v53 = vpop.f32.mrb[34].mxu0  ;;  %v1427_v54 = vpop.f32.mrb[34].mxu1 }
 0x13c   : > { %v1324_v57 = vpop.f32.mrb[35].mxu0  ;;  %v959_v58 = vpop.f32.mrb[35].mxu1 }
 0x13d   : > { %1098 = vst.msk [vmem:[%s1746_s22 + $0x70] sm:$0xff] %vm1083_vm0, %v1065_v51  ;;  %v1066_v59 = vmax.f32 %v952_v44, %v1034_v52  ;;  %v796_v60 = vadd.f32 %v1322_v42, %v1736_v56  ;;  %v1325_v61 = vadd.f32 %v1324_v57, %v1323_v53 }
 0x13f   : > { %1099 = vst.msk [vmem:[%s1746_s22 + $0x78] sm:$0xff] %vm1083_vm0, %v1066_v59  ;;  %v957_v62 = vadd.f32 %v956_v49, %v796_v60  ;;  %v799_v63 = vadd.f32 %v1325_v61, %v1736_v56  ;;  %v844_v61 = vadd.f32 %v1725_v38, %v1736_v56 }
 0x141   : > { %v1035_v0 = vmul.f32 0.2, %v957_v62  ;;  %v960_v2 = vadd.f32 %v959_v58, %v799_v63  ;;  %v1326_v3 = vpop.f32.mrb[36].mxu0  ;;  %v1794_v4 = vpop.f32.mrb[36].mxu1 }
 0x142   : > { %v1327_v5 = vpop.f32.mrb[37].mxu0  ;;  %v972_v1 = vpop.f32.mrb[37].mxu1 }
 0x143   : > { %v1067_v6 = vmax.f32 %v957_v62, %v1035_v0  ;;  %v1036_v7 = vmul.f32 0.2, %v960_v2  ;;  %v1328_v8 = vadd.f32 %v1327_v5, %v1326_v3  ;;  %v1329_v9 = vpop.f32.mrb[38].mxu0  ;;  %v1796_v10 = vpop.f32.mrb[38].mxu1 }
 0x144   : > { %v1330_v12 = vpop.f32.mrb[39].mxu0  ;;  %v975_v13 = vpop.f32.mrb[39].mxu1 }
 0x145   : > { %1100 = vst.msk [vmem:[%s1746_s22 + $0x80] sm:$0xff] %vm1083_vm0, %v1067_v6  ;;  %v1068_v15 = vmax.f32 %v960_v2, %v1036_v7  ;;  %v804_v16 = vadd.f32 %v1328_v8, %v1736_v56  ;;  %v1331_v17 = vadd.f32 %v1330_v12, %v1329_v9 }
 0x147   : > { %1101 = vst.msk [vmem:[%s1746_s22 + $0x88] sm:$0xff] %vm1083_vm0, %v1068_v15  ;;  %v965_v11 = vadd.f32 %v1426_v47, %v804_v16  ;;  %v807_v18 = vadd.f32 %v1331_v17, %v1736_v56 }
 0x149   : > { %v1037_v21 = vmul.f32 0.2, %v965_v11  ;;  %v968_v22 = vadd.f32 %v1427_v54, %v807_v18  ;;  %v1332_v23 = vpop.f32.mrb[40].mxu0  ;;  %v1434_v24 = vpop.f32.mrb[40].mxu1  ;;  %v852_v54 = vadd.f32 %v1729_v50, %v1736_v56  ;;  %v855_v50 = vadd.f32 %v1731_v55, %v1736_v56 }
 0x14a   : > { %v997_v27 = vadd.f32 %v1434_v24, %v836_v20  ;;  %v1333_v28 = vpop.f32.mrb[41].mxu0  ;;  %v988_v29 = vpop.f32.mrb[41].mxu1 }
 0x14b   : > { %v1069_v32 = vmax.f32 %v965_v11, %v1037_v21  ;;  %v1038_v33 = vmul.f32 0.2, %v968_v22  ;;  %v1334_v34 = vadd.f32 %v1333_v28, %v1332_v23  ;;  %v989_v35 = vadd.f32 %v988_v29, %v828_v25  ;;  %v1335_v26 = vpop.f32.mrb[42].mxu0  ;;  %v1435_v37 = vpop.f32.mrb[42].mxu1 }
 0x14c   : > { %v1045_v39 = vmul.f32 0.2, %v997_v27  ;;  %v1000_v36 = vadd.f32 %v1435_v37, %v839_v30  ;;  %v1336_v40 = vpop.f32.mrb[43].mxu0  ;;  %v991_v41 = vpop.f32.mrb[43].mxu1 }
 0x14d   : > { %1102 = vst.msk [vmem:[%s1746_s22 + $0x90] sm:$0xff] %vm1083_vm0, %v1069_v32  ;;  %v1070_v44 = vmax.f32 %v968_v22, %v1038_v33  ;;  %v812_v31 = vadd.f32 %v1334_v34, %v1736_v56  ;;  %v1043_v45 = vmul.f32 0.2, %v989_v35  ;;  %v1337_v46 = vadd.f32 %v1336_v40, %v1335_v26 }
 0x14e   : > { %v1077_v47 = vmax.f32 %v997_v27, %v1045_v39  ;;  %v1046_v48 = vmul.f32 0.2, %v1000_v36  ;;  %v992_v49 = vadd.f32 %v991_v41, %v831_v14 }
 0x14f   : > { %1103 = vst.msk [vmem:[%s1746_s22 + $0x98] sm:$0xff] %vm1083_vm0, %v1070_v44  ;;  %v973_v51 = vadd.f32 %v972_v1, %v812_v31  ;;  %v1075_v52 = vmax.f32 %v989_v35, %v1043_v45  ;;  %v815_v42 = vadd.f32 %v1337_v46, %v1736_v56 }
 0x150   : > { %1110 = vst.msk [vmem:[%s1746_s22 + $0xd0] sm:$0xff] %vm1083_vm0, %v1077_v47  ;;  %v1078_v19 = vmax.f32 %v1000_v36, %v1046_v48  ;;  %v1044_v53 = vmul.f32 0.2, %v992_v49 }
 0x151   : > { %v1039_v57 = vmul.f32 0.2, %v973_v51  ;;  %1108 = vst.msk [vmem:[%s1746_s22 + $0xc0] sm:$0xff] %vm1083_vm0, %v1075_v52  ;;  %v976_v58 = vadd.f32 %v975_v13, %v815_v42  ;;  %v1338_v59 = vpop.f32.mrb[44].mxu0  ;;  %v1438_v60 = vpop.f32.mrb[44].mxu1  ;;  %v847_v13 = vadd.f32 %v1727_v43, %v1736_v56 }
 0x152   : > { %1111 = vst.msk [vmem:[%s1746_s22 + $0xd8] sm:$0xff] %vm1083_vm0, %v1078_v19  ;;  %v1076_v62 = vmax.f32 %v992_v49, %v1044_v53  ;;  %v1013_v63 = vadd.f32 %v1438_v60, %v852_v54  ;;  %v1339_v0 = vpop.f32.mrb[45].mxu0  ;;  %v1004_v2 = vpop.f32.mrb[45].mxu1 }
 0x153   : > { %v1071_v3 = vmax.f32 %v973_v51, %v1039_v57  ;;  %v1040_v5 = vmul.f32 0.2, %v976_v58  ;;  %v1340_v1 = vadd.f32 %v1339_v0, %v1338_v59  ;;  %v1005_v6 = vadd.f32 %v1004_v2, %v844_v61  ;;  %v1341_v7 = vpop.f32.mrb[46].mxu0  ;;  %v1439_v8 = vpop.f32.mrb[46].mxu1 }
 0x154   : > { %1109 = vst.msk [vmem:[%s1746_s22 + $0xc8] sm:$0xff] %vm1083_vm0, %v1076_v62  ;;  %v1049_v38 = vmul.f32 0.2, %v1013_v63  ;;  %v1016_v9 = vadd.f32 %v1439_v8, %v855_v50  ;;  %v1342_v12 = vpop.f32.mrb[47].mxu0  ;;  %v1007_v15 = vpop.f32.mrb[47].mxu1 }
 0x155   : > { %1104 = vst.msk [vmem:[%s1746_s22 + $0xa0] sm:$0xff] %vm1083_vm0, %v1071_v3  ;;  %v1072_v55 = vmax.f32 %v976_v58, %v1040_v5  ;;  %v820_v16 = vadd.f32 %v1340_v1, %v1736_v56  ;;  %v1047_v17 = vmul.f32 0.2, %v1005_v6  ;;  %v1343_v11 = vadd.f32 %v1342_v12, %v1341_v7 }
 0x156   : > { %v1081_v18 = vmax.f32 %v1013_v63, %v1049_v38  ;;  %v1050_v20 = vmul.f32 0.2, %v1016_v9  ;;  %v1008_v21 = vadd.f32 %v1007_v15, %v847_v13 }
 0x157   : > { %1105 = vst.msk [vmem:[%s1746_s22 + $0xa8] sm:$0xff] %vm1083_vm0, %v1072_v55  ;;  %v981_v22 = vadd.f32 %v1794_v4, %v820_v16  ;;  %v1079_v43 = vmax.f32 %v1005_v6, %v1047_v17  ;;  %v823_v23 = vadd.f32 %v1343_v11, %v1736_v56 }
 0x158   : > { %1114 = vst.msk [vmem:[%s1746_s22 + $0xf0] sm:$0xff] %vm1083_vm0, %v1081_v18  ;;  %v1082_v24 = vmax.f32 %v1016_v9, %v1050_v20  ;;  %v1048_v25 = vmul.f32 0.2, %v1008_v21 }
 0x159   : > { %v1041_v27 = vmul.f32 0.2, %v981_v22  ;;  %1112 = vst.msk [vmem:[%s1746_s22 + $0xe0] sm:$0xff] %vm1083_vm0, %v1079_v43  ;;  %v984_v28 = vadd.f32 %v1796_v10, %v823_v23 }
 0x15a   : > { %1115 = vst.msk [vmem:[%s1746_s22 + $0xf8] sm:$0xff] %vm1083_vm0, %v1082_v24  ;;  %v1080_v29 = vmax.f32 %v1008_v21, %v1048_v25 }
 0x15b   : > { %v1073_v30 = vmax.f32 %v981_v22, %v1041_v27  ;;  %v1042_v32 = vmul.f32 0.2, %v984_v28 }
 0x15c   : > { %1113 = vst.msk [vmem:[%s1746_s22 + $0xe8] sm:$0xff] %vm1083_vm0, %v1080_v29 }
 0x15d   : > { %1106 = vst.msk [vmem:[%s1746_s22 + $0xb0] sm:$0xff] %vm1083_vm0, %v1073_v30  ;;  %v1074_v4 = vmax.f32 %v984_v28, %v1042_v32 }
 0x15f   : > { %1107 = vst.msk [vmem:[%s1746_s22 + $0xb8] sm:$0xff] %vm1083_vm0, %v1074_v4 }
 0x160 PF: > { %s13_s12 = sadd.s32 1, %s1559_s12  }
 0x161   : > { %p10_p4 = scmp.ge.s32.totalorder %s13_s12, 4  }
 0x163   :  { %12 = sbr.rel (!%p10_p4) target bundleno = 1 (0x1), region = 62 }

</bundles_post_ra>
